<compile_context>
chip_gen: v7x
topology: tpu7x:2x2x1
jax: 0.10.0
libtpu: 0.0.40
codegen_flags: <defaults>
</compile_context>

<pallas_src>
import math

import jax
import jax.numpy as jnp
from jax.experimental import pallas as pl
from jax.experimental.pallas import tpu as pltpu  # noqa: F401  (not required at this size)

D_MODEL = 32
N_HEAD = 4
HEAD_DIM = D_MODEL // N_HEAD
SEQ = 8
BATCH = 2
N_LAYERS = 2
EPS = 1e-5  # nn.LayerNorm default
_GELU_C = math.sqrt(2.0 / math.pi)

LANE = 128  # padded lane width of every packed slab

# Row offsets inside the per-layer weight slab (all weights pre-transposed so
# the kernel only ever computes `activations @ W`).
ROW_QKV = 0                       # Wqkv : rows [0, D)      -> (D, 128), lanes [0,3D) used
ROW_WO = D_MODEL                  # Wo   : rows [D, 2D)     -> (D, 128), lanes [0,D)  used
ROW_FC = 2 * D_MODEL              # Wfc  : rows [2D, 3D)    -> (D, 128), all lanes used
ROW_PR = 3 * D_MODEL              # Wpr  : rows [3D, 3D+4D) -> (4D,128), lanes [0,D)  used
N_WROWS = 3 * D_MODEL + 4 * D_MODEL   # 224 rows per layer


def _layernorm(x, g, b):
    mu = jnp.mean(x, axis=-1, keepdims=True)
    var = jnp.mean((x - mu) ** 2, axis=-1, keepdims=True)
    return (x - mu) * jax.lax.rsqrt(var + EPS) * g + b


def _gelu_tanh(x):
    # GELU exactly as written in the module:
    # 0.5*x*(1 + tanh(sqrt(2/pi)*(x + 0.044715*x^3)))
    return 0.5 * x * (1.0 + jnp.tanh(_GELU_C * (x + 0.044715 * x * x * x)))


def transformer_kernel(x_ref, w_ref, v_ref, o_ref):
    """Entire Transformer (all layers) in one grid-free invocation.

    x_ref: (B*L, D) activations (rows ordered batch-major).
    w_ref: (N_LAYERS, 224, 128) packed, pre-transposed, lane-padded weights.
    v_ref: (N_LAYERS, 8, 128)   packed LN params and biases (one row each).
    """
    scale = 1.0 / math.sqrt(HEAD_DIM)
    x = x_ref[...]                                            # (B*L, D) f32

    def split_heads(t):
        # (B*L, D) -> (H*B, L, hd), head-major leading axis.
        # Static lane slices + a leading-axis concat only (no transpose op).
        parts = [t[:, h * HEAD_DIM:(h + 1) * HEAD_DIM].reshape(BATCH, SEQ, HEAD_DIM)
                 for h in range(N_HEAD)]
        return jnp.concatenate(parts, axis=0)

    for l in range(N_LAYERS):
        vl = v_ref[l]                                         # (8, 128)
        ln1_g = vl[0:1, :D_MODEL]
        ln1_b = vl[1:2, :D_MODEL]
        bqkv = vl[2:3, :]                                     # lanes [0,3D) used, rest 0
        bo = vl[3:4, :D_MODEL]
        ln2_g = vl[4:5, :D_MODEL]
        ln2_b = vl[5:6, :D_MODEL]
        bfc = vl[6:7, :]
        bpr = vl[7:8, :D_MODEL]

        # ---- a = ln_1(x); fused QKV projection (one 128-lane-aligned matmul) ----
        a = _layernorm(x, ln1_g, ln1_b)
        qkv = jnp.dot(a, w_ref[l, ROW_QKV:ROW_QKV + D_MODEL, :],
                      preferred_element_type=jnp.float32) + bqkv       # (B*L, 128)
        q = qkv[:, 0:D_MODEL] * scale
        k = qkv[:, D_MODEL:2 * D_MODEL]
        v = qkv[:, 2 * D_MODEL:3 * D_MODEL]

        # ---- attention core, heads and batch merged into one (H*B) batch axis ----
        q3, k3, v3 = split_heads(q), split_heads(k), split_heads(v)    # (H*B, L, hd)
        s = jnp.einsum('gqd,gkd->gqk', q3, k3,
                       preferred_element_type=jnp.float32)             # (H*B, L, L)
        s = s - jnp.max(s, axis=-1, keepdims=True)
        p = jnp.exp(s)
        p = p * pl.reciprocal(jnp.sum(p, axis=-1, keepdims=True), approx=True)
        oh = jnp.einsum('gqk,gkd->gqd', p, v3,
                        preferred_element_type=jnp.float32)            # (H*B, L, hd)

        # Re-concatenate heads along lanes, then a single out-projection matmul.
        oh = oh.reshape(N_HEAD, BATCH * SEQ, HEAD_DIM)
        oh = jnp.concatenate([oh[h] for h in range(N_HEAD)], axis=-1)  # (B*L, D)
        attn = jnp.dot(oh, w_ref[l, ROW_WO:ROW_WO + D_MODEL, :],
                       preferred_element_type=jnp.float32)[:, :D_MODEL] + bo
        x = x + attn

        # ---- x = x + mlp(ln_2(x)) ----
        b2 = _layernorm(x, ln2_g, ln2_b)
        h = jnp.dot(b2, w_ref[l, ROW_FC:ROW_FC + D_MODEL, :],
                    preferred_element_type=jnp.float32) + bfc          # (B*L, 128)
        h = _gelu_tanh(h)
        proj = jnp.dot(h, w_ref[l, ROW_PR:ROW_PR + 4 * D_MODEL, :],
                       preferred_element_type=jnp.float32)[:, :D_MODEL] + bpr
        x = x + proj

    o_ref[...] = x.astype(o_ref.dtype)


# ----------------------------------------------------------------------------
# Parameter handling (PyTorch layout -> packed kernel layout, done ONCE)
# ----------------------------------------------------------------------------

def init_layer_params(key, d_model=D_MODEL):
    """Parameters in PyTorch (nn.MultiheadAttention / nn.Linear / nn.LayerNorm) layout."""
    ks = jax.random.split(key, 8)
    s = 0.02
    return dict(
        ln1_w=jnp.ones((d_model,), jnp.float32),
        ln1_b=jnp.zeros((d_model,), jnp.float32),
        in_proj_w=s * jax.random.normal(ks[0], (3 * d_model, d_model), jnp.float32),
        in_proj_b=s * jax.random.normal(ks[1], (3 * d_model,), jnp.float32),
        out_proj_w=s * jax.random.normal(ks[2], (d_model, d_model), jnp.float32),
        out_proj_b=s * jax.random.normal(ks[3], (d_model,), jnp.float32),
        ln2_w=jnp.ones((d_model,), jnp.float32),
        ln2_b=jnp.zeros((d_model,), jnp.float32),
        c_fc_w=s * jax.random.normal(ks[4], (4 * d_model, d_model), jnp.float32),
        c_fc_b=s * jax.random.normal(ks[5], (4 * d_model,), jnp.float32),
        c_proj_w=s * jax.random.normal(ks[6], (d_model, 4 * d_model), jnp.float32),
        c_proj_b=s * jax.random.normal(ks[7], (d_model,), jnp.float32),
    )


def _pad_lanes(a, width=LANE):
    """Zero-pad the last dim of a 1-D/2-D array to `width` lanes."""
    pad = width - a.shape[-1]
    if pad == 0:
        return a
    cfg = [(0, 0)] * (a.ndim - 1) + [(0, pad)]
    return jnp.pad(a, cfg)


def pack_params(layer_params):
    """Pack all weights into two lane-dense slabs.

    Returns:
      w_packed: (N_LAYERS, 224, 128)  [Wqkv | Wo | Wfc | Wpr], pre-transposed,
                zero-padded to 128 lanes.
      v_packed: (N_LAYERS, 8, 128)    LN gains/biases + all linear biases,
                one 128-lane row each.
    """
    w_slabs, v_slabs = [], []
    for p in layer_params:
        wqkv = _pad_lanes(p["in_proj_w"].T)    # (D, 3D) -> (D, 128)
        wo = _pad_lanes(p["out_proj_w"].T)     # (D, D)  -> (D, 128)
        wfc = _pad_lanes(p["c_fc_w"].T)        # (D, 4D) == (D, 128)
        wpr = _pad_lanes(p["c_proj_w"].T)      # (4D, D) -> (4D, 128)
        w_slabs.append(jnp.concatenate([wqkv, wo, wfc, wpr], axis=0))   # (224, 128)

        rows = [p["ln1_w"], p["ln1_b"], p["in_proj_b"], p["out_proj_b"],
                p["ln2_w"], p["ln2_b"], p["c_fc_b"], p["c_proj_b"]]
        v_slabs.append(jnp.stack([_pad_lanes(r) for r in rows], axis=0))  # (8, 128)

    return jnp.stack(w_slabs, axis=0), jnp.stack(v_slabs, axis=0)


@jax.jit
def transformer_forward(x_lbd, w_packed, v_packed):
    """x_lbd: (L, B, D) in the PyTorch MultiheadAttention convention."""
    L, B, D = x_lbd.shape
    x_flat = jnp.transpose(x_lbd, (1, 0, 2)).reshape(B * L, D)

    # Single grid-free invocation: 3 inputs + 1 output = 4 DMAs; everything
    # (~240 KiB) lives whole in VMEM.  No grid / no cross-TC split at this size.
    out = pl.pallas_call(
        transformer_kernel,
        out_shape=jax.ShapeDtypeStruct((B * L, D), jnp.float32),
    )(x_flat, w_packed, v_packed)

    return jnp.transpose(out.reshape(B, L, D), (1, 0, 2))


# ----------------------------------------------------------------------------
# Pure-JAX reference (PyTorch-layout math) for correctness checking
# ----------------------------------------------------------------------------

def reference_transformer(x_lbd, layer_params):
    x = x_lbd  # (L, B, D)
    L, B, D = x.shape
    for p in layer_params:
        a = _layernorm(x, p["ln1_w"], p["ln1_b"])
        qkv = a @ p["in_proj_w"].T + p["in_proj_b"]
        q, k, v = jnp.split(qkv, 3, axis=-1)

        def split_heads(t):
            return t.reshape(L, B, N_HEAD, HEAD_DIM).transpose(1, 2, 0, 3)

        qh = split_heads(q) / math.sqrt(HEAD_DIM)
        kh = split_heads(k)
        vh = split_heads(v)
        s = jnp.einsum('bhqd,bhkd->bhqk', qh, kh)
        pr = jax.nn.softmax(s, axis=-1)
        o = jnp.einsum('bhqk,bhkd->bhqd', pr, vh)
        o = o.transpose(2, 0, 1, 3).reshape(L, B, D)
        attn = o @ p["out_proj_w"].T + p["out_proj_b"]
        x = x + attn

        b = _layernorm(x, p["ln2_w"], p["ln2_b"])
        hdn = _gelu_tanh(b @ p["c_fc_w"].T + p["c_fc_b"])
        x = x + hdn @ p["c_proj_w"].T + p["c_proj_b"]
    return x


if __name__ == "__main__":
    key = jax.random.PRNGKey(0)
    kx, kp = jax.random.split(key)
    x = jax.random.normal(kx, (SEQ, BATCH, D_MODEL), jnp.float32)  # (L, B, D)
    layer_keys = jax.random.split(kp, N_LAYERS)
    layer_params = [init_layer_params(k) for k in layer_keys]

    # Pack once (hoisted out of the jitted forward).
    w_packed, v_packed = pack_params(layer_params)
    w_packed = jax.block_until_ready(w_packed)
    v_packed = jax.block_until_ready(v_packed)

    out = transformer_forward(x, w_packed, v_packed)
    out = jax.block_until_ready(out)

    ref = reference_transformer(x, layer_params)
    assert out.shape == (SEQ, BATCH, D_MODEL)
    max_err = jnp.max(jnp.abs(out - ref))
    assert jnp.allclose(out, ref, atol=5e-4, rtol=5e-4), f"max err {max_err}"
    print("KERNEL_OK")
</pallas_src>

<mosaic_0001>
module attributes {stable_mosaic.version = 11 : i64} {
  func.func @transformer_kernel(%arg0: memref<16x32xf32, #tpu.memory_space<vmem>>, %arg1: memref<2x224x128xf32, #tpu.memory_space<vmem>>, %arg2: memref<2x8x128xf32, #tpu.memory_space<vmem>>, %arg3: memref<16x32xf32, #tpu.memory_space<vmem>>) attributes {dimension_semantics = [], scalar_prefetch = 0 : i64, scratch_operands = 0 : i64, tpu.core_type = #tpu.core_type<tc>} {
    %c0 = arith.constant 0 : index
    %c0_0 = arith.constant 0 : index
    %0 = vector.load %arg0[%c0, %c0_0] : memref<16x32xf32, #tpu.memory_space<vmem>>, vector<16x32xf32>
    %c0_1 = arith.constant 0 : index
    %c0_2 = arith.constant 0 : index
    %c0_3 = arith.constant 0 : index
    %1 = vector.load %arg2[%c0_1, %c0_2, %c0_3] : memref<2x8x128xf32, #tpu.memory_space<vmem>>, vector<1x8x128xf32>
    %2 = vector.shape_cast %1 : vector<1x8x128xf32> to vector<8x128xf32>
    %3 = vector.extract_strided_slice %2 {offsets = [0, 0], sizes = [1, 32], strides = [1, 1]} : vector<8x128xf32> to vector<1x32xf32>
    %4 = vector.extract_strided_slice %2 {offsets = [1, 0], sizes = [1, 32], strides = [1, 1]} : vector<8x128xf32> to vector<1x32xf32>
    %5 = vector.extract_strided_slice %2 {offsets = [2, 0], sizes = [1, 128], strides = [1, 1]} : vector<8x128xf32> to vector<1x128xf32>
    %6 = vector.extract_strided_slice %2 {offsets = [3, 0], sizes = [1, 32], strides = [1, 1]} : vector<8x128xf32> to vector<1x32xf32>
    %7 = vector.extract_strided_slice %2 {offsets = [4, 0], sizes = [1, 32], strides = [1, 1]} : vector<8x128xf32> to vector<1x32xf32>
    %8 = vector.extract_strided_slice %2 {offsets = [5, 0], sizes = [1, 32], strides = [1, 1]} : vector<8x128xf32> to vector<1x32xf32>
    %9 = vector.extract_strided_slice %2 {offsets = [6, 0], sizes = [1, 128], strides = [1, 1]} : vector<8x128xf32> to vector<1x128xf32>
    %10 = vector.extract_strided_slice %2 {offsets = [7, 0], sizes = [1, 32], strides = [1, 1]} : vector<8x128xf32> to vector<1x32xf32>
    %cst = arith.constant dense<0.000000e+00> : vector<16xf32>
    %11 = vector.multi_reduction <add>, %0, %cst [1] : vector<16x32xf32> to vector<16xf32>
    %12 = vector.shape_cast %11 : vector<16xf32> to vector<16x1xf32>
    %cst_4 = arith.constant 3.200000e+01 : f32
    %13 = vector.broadcast %cst_4 : f32 to vector<16x1xf32>
    %14 = arith.divf %12, %13 : vector<16x1xf32>
    %15 = vector.broadcast %14 : vector<16x1xf32> to vector<16x32xf32>
    %16 = arith.subf %0, %15 : vector<16x32xf32>
    %17 = arith.mulf %16, %16 : vector<16x32xf32>
    %cst_5 = arith.constant dense<0.000000e+00> : vector<16xf32>
    %18 = vector.multi_reduction <add>, %17, %cst_5 [1] : vector<16x32xf32> to vector<16xf32>
    %19 = vector.shape_cast %18 : vector<16xf32> to vector<16x1xf32>
    %cst_6 = arith.constant 3.200000e+01 : f32
    %20 = vector.broadcast %cst_6 : f32 to vector<16x1xf32>
    %21 = arith.divf %19, %20 : vector<16x1xf32>
    %22 = vector.broadcast %14 : vector<16x1xf32> to vector<16x32xf32>
    %23 = arith.subf %0, %22 : vector<16x32xf32>
    %cst_7 = arith.constant 9.99999974E-6 : f32
    %24 = vector.broadcast %cst_7 : f32 to vector<16x1xf32>
    %25 = arith.addf %21, %24 : vector<16x1xf32>
    %26 = math.rsqrt %25 : vector<16x1xf32>
    %27 = vector.broadcast %26 : vector<16x1xf32> to vector<16x32xf32>
    %28 = arith.mulf %23, %27 : vector<16x32xf32>
    %29 = vector.broadcast %3 : vector<1x32xf32> to vector<16x32xf32>
    %30 = arith.mulf %28, %29 : vector<16x32xf32>
    %31 = vector.broadcast %4 : vector<1x32xf32> to vector<16x32xf32>
    %32 = arith.addf %30, %31 : vector<16x32xf32>
    %c0_8 = arith.constant 0 : index
    %c0_9 = arith.constant 0 : index
    %c0_10 = arith.constant 0 : index
    %33 = vector.load %arg1[%c0_8, %c0_9, %c0_10] : memref<2x224x128xf32, #tpu.memory_space<vmem>>, vector<1x32x128xf32>
    %34 = vector.shape_cast %33 : vector<1x32x128xf32> to vector<32x128xf32>
    %cst_11 = arith.constant dense<0.000000e+00> : vector<16x128xf32>
    %35 = tpu.matmul %32, %34, %cst_11 {dimension_numbers = #tpu.dot_dimension_numbers<[1], [0], [0], [1], [0, 0, 1, 1], [], []>} : vector<16x32xf32>, vector<32x128xf32>, vector<16x128xf32> -> vector<16x128xf32>
    %36 = vector.broadcast %5 : vector<1x128xf32> to vector<16x128xf32>
    %37 = arith.addf %35, %36 : vector<16x128xf32>
    %38 = vector.extract_strided_slice %37 {offsets = [0, 0], sizes = [16, 32], strides = [1, 1]} : vector<16x128xf32> to vector<16x32xf32>
    %cst_12 = arith.constant 0.353553385 : f32
    %39 = vector.broadcast %cst_12 : f32 to vector<16x32xf32>
    %40 = arith.mulf %38, %39 : vector<16x32xf32>
    %41 = vector.extract_strided_slice %37 {offsets = [0, 32], sizes = [16, 32], strides = [1, 1]} : vector<16x128xf32> to vector<16x32xf32>
    %42 = vector.extract_strided_slice %37 {offsets = [0, 64], sizes = [16, 32], strides = [1, 1]} : vector<16x128xf32> to vector<16x32xf32>
    %43 = vector.extract_strided_slice %40 {offsets = [0, 0], sizes = [16, 8], strides = [1, 1]} : vector<16x32xf32> to vector<16x8xf32>
    %44 = vector.shape_cast %43 : vector<16x8xf32> to vector<2x8x8xf32>
    %45 = vector.extract_strided_slice %40 {offsets = [0, 8], sizes = [16, 8], strides = [1, 1]} : vector<16x32xf32> to vector<16x8xf32>
    %46 = vector.shape_cast %45 : vector<16x8xf32> to vector<2x8x8xf32>
    %47 = vector.extract_strided_slice %40 {offsets = [0, 16], sizes = [16, 8], strides = [1, 1]} : vector<16x32xf32> to vector<16x8xf32>
    %48 = vector.shape_cast %47 : vector<16x8xf32> to vector<2x8x8xf32>
    %49 = vector.extract_strided_slice %40 {offsets = [0, 24], sizes = [16, 8], strides = [1, 1]} : vector<16x32xf32> to vector<16x8xf32>
    %50 = vector.shape_cast %49 : vector<16x8xf32> to vector<2x8x8xf32>
    %51 = tpu.concatenate %44, %46, %48, %50 in 0 : vector<2x8x8xf32>, vector<2x8x8xf32>, vector<2x8x8xf32>, vector<2x8x8xf32> -> vector<8x8x8xf32>
    %52 = vector.extract_strided_slice %41 {offsets = [0, 0], sizes = [16, 8], strides = [1, 1]} : vector<16x32xf32> to vector<16x8xf32>
    %53 = vector.shape_cast %52 : vector<16x8xf32> to vector<2x8x8xf32>
    %54 = vector.extract_strided_slice %41 {offsets = [0, 8], sizes = [16, 8], strides = [1, 1]} : vector<16x32xf32> to vector<16x8xf32>
    %55 = vector.shape_cast %54 : vector<16x8xf32> to vector<2x8x8xf32>
    %56 = vector.extract_strided_slice %41 {offsets = [0, 16], sizes = [16, 8], strides = [1, 1]} : vector<16x32xf32> to vector<16x8xf32>
    %57 = vector.shape_cast %56 : vector<16x8xf32> to vector<2x8x8xf32>
    %58 = vector.extract_strided_slice %41 {offsets = [0, 24], sizes = [16, 8], strides = [1, 1]} : vector<16x32xf32> to vector<16x8xf32>
    %59 = vector.shape_cast %58 : vector<16x8xf32> to vector<2x8x8xf32>
    %60 = tpu.concatenate %53, %55, %57, %59 in 0 : vector<2x8x8xf32>, vector<2x8x8xf32>, vector<2x8x8xf32>, vector<2x8x8xf32> -> vector<8x8x8xf32>
    %61 = vector.extract_strided_slice %42 {offsets = [0, 0], sizes = [16, 8], strides = [1, 1]} : vector<16x32xf32> to vector<16x8xf32>
    %62 = vector.shape_cast %61 : vector<16x8xf32> to vector<2x8x8xf32>
    %63 = vector.extract_strided_slice %42 {offsets = [0, 8], sizes = [16, 8], strides = [1, 1]} : vector<16x32xf32> to vector<16x8xf32>
    %64 = vector.shape_cast %63 : vector<16x8xf32> to vector<2x8x8xf32>
    %65 = vector.extract_strided_slice %42 {offsets = [0, 16], sizes = [16, 8], strides = [1, 1]} : vector<16x32xf32> to vector<16x8xf32>
    %66 = vector.shape_cast %65 : vector<16x8xf32> to vector<2x8x8xf32>
    %67 = vector.extract_strided_slice %42 {offsets = [0, 24], sizes = [16, 8], strides = [1, 1]} : vector<16x32xf32> to vector<16x8xf32>
    %68 = vector.shape_cast %67 : vector<16x8xf32> to vector<2x8x8xf32>
    %69 = tpu.concatenate %62, %64, %66, %68 in 0 : vector<2x8x8xf32>, vector<2x8x8xf32>, vector<2x8x8xf32>, vector<2x8x8xf32> -> vector<8x8x8xf32>
    "tpu.trace_start"() <{level = 10 : i32, message = "gqd,gkd->gqk"}> : () -> ()
    %cst_13 = arith.constant dense<0.000000e+00> : vector<8x8x8xf32>
    %70 = tpu.matmul %51, %60, %cst_13 {dimension_numbers = #tpu.dot_dimension_numbers<[2], [2], [1], [1], [0, 0, 0, 1, 1, 1], [0], [0]>} : vector<8x8x8xf32>, vector<8x8x8xf32>, vector<8x8x8xf32> -> vector<8x8x8xf32>
    "tpu.trace_stop"() : () -> ()
    %cst_14 = arith.constant dense<0xFF800000> : vector<8x8xf32>
    %71 = vector.multi_reduction <maximumf>, %70, %cst_14 [2] : vector<8x8x8xf32> to vector<8x8xf32>
    %72 = vector.shape_cast %71 : vector<8x8xf32> to vector<8x8x1xf32>
    %73 = vector.broadcast %72 : vector<8x8x1xf32> to vector<8x8x8xf32>
    %74 = arith.subf %70, %73 : vector<8x8x8xf32>
    %75 = math.exp %74 : vector<8x8x8xf32>
    %cst_15 = arith.constant dense<0.000000e+00> : vector<8x8xf32>
    %76 = vector.multi_reduction <add>, %75, %cst_15 [2] : vector<8x8x8xf32> to vector<8x8xf32>
    %77 = vector.shape_cast %76 : vector<8x8xf32> to vector<8x8x1xf32>
    %78 = tpu.reciprocal %77 {approx = true} : vector<8x8x1xf32> -> vector<8x8x1xf32>
    %79 = vector.broadcast %78 : vector<8x8x1xf32> to vector<8x8x8xf32>
    %80 = arith.mulf %75, %79 : vector<8x8x8xf32>
    "tpu.trace_start"() <{level = 10 : i32, message = "gqk,gkd->gqd"}> : () -> ()
    %cst_16 = arith.constant dense<0.000000e+00> : vector<8x8x8xf32>
    %81 = tpu.matmul %80, %69, %cst_16 {dimension_numbers = #tpu.dot_dimension_numbers<[2], [1], [1], [2], [0, 0, 0, 1, 1, 2], [0], [0]>} : vector<8x8x8xf32>, vector<8x8x8xf32>, vector<8x8x8xf32> -> vector<8x8x8xf32>
    "tpu.trace_stop"() : () -> ()
    %82 = vector.shape_cast %81 : vector<8x8x8xf32> to vector<4x16x8xf32>
    %83 = vector.extract_strided_slice %82 {offsets = [0, 0, 0], sizes = [1, 16, 8], strides = [1, 1, 1]} : vector<4x16x8xf32> to vector<1x16x8xf32>
    %84 = vector.shape_cast %83 : vector<1x16x8xf32> to vector<16x8xf32>
    %85 = vector.extract_strided_slice %82 {offsets = [1, 0, 0], sizes = [1, 16, 8], strides = [1, 1, 1]} : vector<4x16x8xf32> to vector<1x16x8xf32>
    %86 = vector.shape_cast %85 : vector<1x16x8xf32> to vector<16x8xf32>
    %87 = vector.extract_strided_slice %82 {offsets = [2, 0, 0], sizes = [1, 16, 8], strides = [1, 1, 1]} : vector<4x16x8xf32> to vector<1x16x8xf32>
    %88 = vector.shape_cast %87 : vector<1x16x8xf32> to vector<16x8xf32>
    %89 = vector.extract_strided_slice %82 {offsets = [3, 0, 0], sizes = [1, 16, 8], strides = [1, 1, 1]} : vector<4x16x8xf32> to vector<1x16x8xf32>
    %90 = vector.shape_cast %89 : vector<1x16x8xf32> to vector<16x8xf32>
    %91 = tpu.concatenate %84, %86, %88, %90 in 1 : vector<16x8xf32>, vector<16x8xf32>, vector<16x8xf32>, vector<16x8xf32> -> vector<16x32xf32>
    %c0_17 = arith.constant 0 : index
    %c32 = arith.constant 32 : index
    %c0_18 = arith.constant 0 : index
    %92 = vector.load %arg1[%c0_17, %c32, %c0_18] : memref<2x224x128xf32, #tpu.memory_space<vmem>>, vector<1x32x128xf32>
    %93 = vector.shape_cast %92 : vector<1x32x128xf32> to vector<32x128xf32>
    %cst_19 = arith.constant dense<0.000000e+00> : vector<16x128xf32>
    %94 = tpu.matmul %91, %93, %cst_19 {dimension_numbers = #tpu.dot_dimension_numbers<[1], [0], [0], [1], [0, 0, 1, 1], [], []>} : vector<16x32xf32>, vector<32x128xf32>, vector<16x128xf32> -> vector<16x128xf32>
    %95 = vector.extract_strided_slice %94 {offsets = [0, 0], sizes = [16, 32], strides = [1, 1]} : vector<16x128xf32> to vector<16x32xf32>
    %96 = vector.broadcast %6 : vector<1x32xf32> to vector<16x32xf32>
    %97 = arith.addf %95, %96 : vector<16x32xf32>
    %98 = arith.addf %0, %97 : vector<16x32xf32>
    %cst_20 = arith.constant dense<0.000000e+00> : vector<16xf32>
    %99 = vector.multi_reduction <add>, %98, %cst_20 [1] : vector<16x32xf32> to vector<16xf32>
    %100 = vector.shape_cast %99 : vector<16xf32> to vector<16x1xf32>
    %cst_21 = arith.constant 3.200000e+01 : f32
    %101 = vector.broadcast %cst_21 : f32 to vector<16x1xf32>
    %102 = arith.divf %100, %101 : vector<16x1xf32>
    %103 = vector.broadcast %102 : vector<16x1xf32> to vector<16x32xf32>
    %104 = arith.subf %98, %103 : vector<16x32xf32>
    %105 = arith.mulf %104, %104 : vector<16x32xf32>
    %cst_22 = arith.constant dense<0.000000e+00> : vector<16xf32>
    %106 = vector.multi_reduction <add>, %105, %cst_22 [1] : vector<16x32xf32> to vector<16xf32>
    %107 = vector.shape_cast %106 : vector<16xf32> to vector<16x1xf32>
    %cst_23 = arith.constant 3.200000e+01 : f32
    %108 = vector.broadcast %cst_23 : f32 to vector<16x1xf32>
    %109 = arith.divf %107, %108 : vector<16x1xf32>
    %110 = vector.broadcast %102 : vector<16x1xf32> to vector<16x32xf32>
    %111 = arith.subf %98, %110 : vector<16x32xf32>
    %cst_24 = arith.constant 9.99999974E-6 : f32
    %112 = vector.broadcast %cst_24 : f32 to vector<16x1xf32>
    %113 = arith.addf %109, %112 : vector<16x1xf32>
    %114 = math.rsqrt %113 : vector<16x1xf32>
    %115 = vector.broadcast %114 : vector<16x1xf32> to vector<16x32xf32>
    %116 = arith.mulf %111, %115 : vector<16x32xf32>
    %117 = vector.broadcast %7 : vector<1x32xf32> to vector<16x32xf32>
    %118 = arith.mulf %116, %117 : vector<16x32xf32>
    %119 = vector.broadcast %8 : vector<1x32xf32> to vector<16x32xf32>
    %120 = arith.addf %118, %119 : vector<16x32xf32>
    %c0_25 = arith.constant 0 : index
    %c64 = arith.constant 64 : index
    %c0_26 = arith.constant 0 : index
    %121 = vector.load %arg1[%c0_25, %c64, %c0_26] : memref<2x224x128xf32, #tpu.memory_space<vmem>>, vector<1x32x128xf32>
    %122 = vector.shape_cast %121 : vector<1x32x128xf32> to vector<32x128xf32>
    %cst_27 = arith.constant dense<0.000000e+00> : vector<16x128xf32>
    %123 = tpu.matmul %120, %122, %cst_27 {dimension_numbers = #tpu.dot_dimension_numbers<[1], [0], [0], [1], [0, 0, 1, 1], [], []>} : vector<16x32xf32>, vector<32x128xf32>, vector<16x128xf32> -> vector<16x128xf32>
    %124 = vector.broadcast %9 : vector<1x128xf32> to vector<16x128xf32>
    %125 = arith.addf %123, %124 : vector<16x128xf32>
    %cst_28 = arith.constant 5.000000e-01 : f32
    %126 = vector.broadcast %cst_28 : f32 to vector<16x128xf32>
    %127 = arith.mulf %126, %125 : vector<16x128xf32>
    %cst_29 = arith.constant 4.471500e-02 : f32
    %128 = vector.broadcast %cst_29 : f32 to vector<16x128xf32>
    %129 = arith.mulf %128, %125 : vector<16x128xf32>
    %130 = arith.mulf %129, %125 : vector<16x128xf32>
    %131 = arith.mulf %130, %125 : vector<16x128xf32>
    %132 = arith.addf %125, %131 : vector<16x128xf32>
    %cst_30 = arith.constant 0.797884583 : f32
    %133 = vector.broadcast %cst_30 : f32 to vector<16x128xf32>
    %134 = arith.mulf %133, %132 : vector<16x128xf32>
    %135 = math.tanh %134 : vector<16x128xf32>
    %cst_31 = arith.constant 1.000000e+00 : f32
    %136 = vector.broadcast %cst_31 : f32 to vector<16x128xf32>
    %137 = arith.addf %136, %135 : vector<16x128xf32>
    %138 = arith.mulf %127, %137 : vector<16x128xf32>
    %c0_32 = arith.constant 0 : index
    %c96 = arith.constant 96 : index
    %c0_33 = arith.constant 0 : index
    %139 = vector.load %arg1[%c0_32, %c96, %c0_33] : memref<2x224x128xf32, #tpu.memory_space<vmem>>, vector<1x128x128xf32>
    %140 = vector.shape_cast %139 : vector<1x128x128xf32> to vector<128x128xf32>
    %cst_34 = arith.constant dense<0.000000e+00> : vector<16x128xf32>
    %141 = tpu.matmul %138, %140, %cst_34 {dimension_numbers = #tpu.dot_dimension_numbers<[1], [0], [0], [1], [0, 0, 1, 1], [], []>} : vector<16x128xf32>, vector<128x128xf32>, vector<16x128xf32> -> vector<16x128xf32>
    %142 = vector.extract_strided_slice %141 {offsets = [0, 0], sizes = [16, 32], strides = [1, 1]} : vector<16x128xf32> to vector<16x32xf32>
    %143 = vector.broadcast %10 : vector<1x32xf32> to vector<16x32xf32>
    %144 = arith.addf %142, %143 : vector<16x32xf32>
    %145 = arith.addf %98, %144 : vector<16x32xf32>
    %c1 = arith.constant 1 : index
    %c0_35 = arith.constant 0 : index
    %c0_36 = arith.constant 0 : index
    %146 = vector.load %arg2[%c1, %c0_35, %c0_36] : memref<2x8x128xf32, #tpu.memory_space<vmem>>, vector<1x8x128xf32>
    %147 = vector.shape_cast %146 : vector<1x8x128xf32> to vector<8x128xf32>
    %148 = vector.extract_strided_slice %147 {offsets = [0, 0], sizes = [1, 32], strides = [1, 1]} : vector<8x128xf32> to vector<1x32xf32>
    %149 = vector.extract_strided_slice %147 {offsets = [1, 0], sizes = [1, 32], strides = [1, 1]} : vector<8x128xf32> to vector<1x32xf32>
    %150 = vector.extract_strided_slice %147 {offsets = [2, 0], sizes = [1, 128], strides = [1, 1]} : vector<8x128xf32> to vector<1x128xf32>
    %151 = vector.extract_strided_slice %147 {offsets = [3, 0], sizes = [1, 32], strides = [1, 1]} : vector<8x128xf32> to vector<1x32xf32>
    %152 = vector.extract_strided_slice %147 {offsets = [4, 0], sizes = [1, 32], strides = [1, 1]} : vector<8x128xf32> to vector<1x32xf32>
    %153 = vector.extract_strided_slice %147 {offsets = [5, 0], sizes = [1, 32], strides = [1, 1]} : vector<8x128xf32> to vector<1x32xf32>
    %154 = vector.extract_strided_slice %147 {offsets = [6, 0], sizes = [1, 128], strides = [1, 1]} : vector<8x128xf32> to vector<1x128xf32>
    %155 = vector.extract_strided_slice %147 {offsets = [7, 0], sizes = [1, 32], strides = [1, 1]} : vector<8x128xf32> to vector<1x32xf32>
    %cst_37 = arith.constant dense<0.000000e+00> : vector<16xf32>
    %156 = vector.multi_reduction <add>, %145, %cst_37 [1] : vector<16x32xf32> to vector<16xf32>
    %157 = vector.shape_cast %156 : vector<16xf32> to vector<16x1xf32>
    %cst_38 = arith.constant 3.200000e+01 : f32
    %158 = vector.broadcast %cst_38 : f32 to vector<16x1xf32>
    %159 = arith.divf %157, %158 : vector<16x1xf32>
    %160 = vector.broadcast %159 : vector<16x1xf32> to vector<16x32xf32>
    %161 = arith.subf %145, %160 : vector<16x32xf32>
    %162 = arith.mulf %161, %161 : vector<16x32xf32>
    %cst_39 = arith.constant dense<0.000000e+00> : vector<16xf32>
    %163 = vector.multi_reduction <add>, %162, %cst_39 [1] : vector<16x32xf32> to vector<16xf32>
    %164 = vector.shape_cast %163 : vector<16xf32> to vector<16x1xf32>
    %cst_40 = arith.constant 3.200000e+01 : f32
    %165 = vector.broadcast %cst_40 : f32 to vector<16x1xf32>
    %166 = arith.divf %164, %165 : vector<16x1xf32>
    %167 = vector.broadcast %159 : vector<16x1xf32> to vector<16x32xf32>
    %168 = arith.subf %145, %167 : vector<16x32xf32>
    %cst_41 = arith.constant 9.99999974E-6 : f32
    %169 = vector.broadcast %cst_41 : f32 to vector<16x1xf32>
    %170 = arith.addf %166, %169 : vector<16x1xf32>
    %171 = math.rsqrt %170 : vector<16x1xf32>
    %172 = vector.broadcast %171 : vector<16x1xf32> to vector<16x32xf32>
    %173 = arith.mulf %168, %172 : vector<16x32xf32>
    %174 = vector.broadcast %148 : vector<1x32xf32> to vector<16x32xf32>
    %175 = arith.mulf %173, %174 : vector<16x32xf32>
    %176 = vector.broadcast %149 : vector<1x32xf32> to vector<16x32xf32>
    %177 = arith.addf %175, %176 : vector<16x32xf32>
    %c1_42 = arith.constant 1 : index
    %c0_43 = arith.constant 0 : index
    %c0_44 = arith.constant 0 : index
    %178 = vector.load %arg1[%c1_42, %c0_43, %c0_44] : memref<2x224x128xf32, #tpu.memory_space<vmem>>, vector<1x32x128xf32>
    %179 = vector.shape_cast %178 : vector<1x32x128xf32> to vector<32x128xf32>
    %cst_45 = arith.constant dense<0.000000e+00> : vector<16x128xf32>
    %180 = tpu.matmul %177, %179, %cst_45 {dimension_numbers = #tpu.dot_dimension_numbers<[1], [0], [0], [1], [0, 0, 1, 1], [], []>} : vector<16x32xf32>, vector<32x128xf32>, vector<16x128xf32> -> vector<16x128xf32>
    %181 = vector.broadcast %150 : vector<1x128xf32> to vector<16x128xf32>
    %182 = arith.addf %180, %181 : vector<16x128xf32>
    %183 = vector.extract_strided_slice %182 {offsets = [0, 0], sizes = [16, 32], strides = [1, 1]} : vector<16x128xf32> to vector<16x32xf32>
    %cst_46 = arith.constant 0.353553385 : f32
    %184 = vector.broadcast %cst_46 : f32 to vector<16x32xf32>
    %185 = arith.mulf %183, %184 : vector<16x32xf32>
    %186 = vector.extract_strided_slice %182 {offsets = [0, 32], sizes = [16, 32], strides = [1, 1]} : vector<16x128xf32> to vector<16x32xf32>
    %187 = vector.extract_strided_slice %182 {offsets = [0, 64], sizes = [16, 32], strides = [1, 1]} : vector<16x128xf32> to vector<16x32xf32>
    %188 = vector.extract_strided_slice %185 {offsets = [0, 0], sizes = [16, 8], strides = [1, 1]} : vector<16x32xf32> to vector<16x8xf32>
    %189 = vector.shape_cast %188 : vector<16x8xf32> to vector<2x8x8xf32>
    %190 = vector.extract_strided_slice %185 {offsets = [0, 8], sizes = [16, 8], strides = [1, 1]} : vector<16x32xf32> to vector<16x8xf32>
    %191 = vector.shape_cast %190 : vector<16x8xf32> to vector<2x8x8xf32>
    %192 = vector.extract_strided_slice %185 {offsets = [0, 16], sizes = [16, 8], strides = [1, 1]} : vector<16x32xf32> to vector<16x8xf32>
    %193 = vector.shape_cast %192 : vector<16x8xf32> to vector<2x8x8xf32>
    %194 = vector.extract_strided_slice %185 {offsets = [0, 24], sizes = [16, 8], strides = [1, 1]} : vector<16x32xf32> to vector<16x8xf32>
    %195 = vector.shape_cast %194 : vector<16x8xf32> to vector<2x8x8xf32>
    %196 = tpu.concatenate %189, %191, %193, %195 in 0 : vector<2x8x8xf32>, vector<2x8x8xf32>, vector<2x8x8xf32>, vector<2x8x8xf32> -> vector<8x8x8xf32>
    %197 = vector.extract_strided_slice %186 {offsets = [0, 0], sizes = [16, 8], strides = [1, 1]} : vector<16x32xf32> to vector<16x8xf32>
    %198 = vector.shape_cast %197 : vector<16x8xf32> to vector<2x8x8xf32>
    %199 = vector.extract_strided_slice %186 {offsets = [0, 8], sizes = [16, 8], strides = [1, 1]} : vector<16x32xf32> to vector<16x8xf32>
    %200 = vector.shape_cast %199 : vector<16x8xf32> to vector<2x8x8xf32>
    %201 = vector.extract_strided_slice %186 {offsets = [0, 16], sizes = [16, 8], strides = [1, 1]} : vector<16x32xf32> to vector<16x8xf32>
    %202 = vector.shape_cast %201 : vector<16x8xf32> to vector<2x8x8xf32>
    %203 = vector.extract_strided_slice %186 {offsets = [0, 24], sizes = [16, 8], strides = [1, 1]} : vector<16x32xf32> to vector<16x8xf32>
    %204 = vector.shape_cast %203 : vector<16x8xf32> to vector<2x8x8xf32>
    %205 = tpu.concatenate %198, %200, %202, %204 in 0 : vector<2x8x8xf32>, vector<2x8x8xf32>, vector<2x8x8xf32>, vector<2x8x8xf32> -> vector<8x8x8xf32>
    %206 = vector.extract_strided_slice %187 {offsets = [0, 0], sizes = [16, 8], strides = [1, 1]} : vector<16x32xf32> to vector<16x8xf32>
    %207 = vector.shape_cast %206 : vector<16x8xf32> to vector<2x8x8xf32>
    %208 = vector.extract_strided_slice %187 {offsets = [0, 8], sizes = [16, 8], strides = [1, 1]} : vector<16x32xf32> to vector<16x8xf32>
    %209 = vector.shape_cast %208 : vector<16x8xf32> to vector<2x8x8xf32>
    %210 = vector.extract_strided_slice %187 {offsets = [0, 16], sizes = [16, 8], strides = [1, 1]} : vector<16x32xf32> to vector<16x8xf32>
    %211 = vector.shape_cast %210 : vector<16x8xf32> to vector<2x8x8xf32>
    %212 = vector.extract_strided_slice %187 {offsets = [0, 24], sizes = [16, 8], strides = [1, 1]} : vector<16x32xf32> to vector<16x8xf32>
    %213 = vector.shape_cast %212 : vector<16x8xf32> to vector<2x8x8xf32>
    %214 = tpu.concatenate %207, %209, %211, %213 in 0 : vector<2x8x8xf32>, vector<2x8x8xf32>, vector<2x8x8xf32>, vector<2x8x8xf32> -> vector<8x8x8xf32>
    "tpu.trace_start"() <{level = 10 : i32, message = "gqd,gkd->gqk"}> : () -> ()
    %cst_47 = arith.constant dense<0.000000e+00> : vector<8x8x8xf32>
    %215 = tpu.matmul %196, %205, %cst_47 {dimension_numbers = #tpu.dot_dimension_numbers<[2], [2], [1], [1], [0, 0, 0, 1, 1, 1], [0], [0]>} : vector<8x8x8xf32>, vector<8x8x8xf32>, vector<8x8x8xf32> -> vector<8x8x8xf32>
    "tpu.trace_stop"() : () -> ()
    %cst_48 = arith.constant dense<0xFF800000> : vector<8x8xf32>
    %216 = vector.multi_reduction <maximumf>, %215, %cst_48 [2] : vector<8x8x8xf32> to vector<8x8xf32>
    %217 = vector.shape_cast %216 : vector<8x8xf32> to vector<8x8x1xf32>
    %218 = vector.broadcast %217 : vector<8x8x1xf32> to vector<8x8x8xf32>
    %219 = arith.subf %215, %218 : vector<8x8x8xf32>
    %220 = math.exp %219 : vector<8x8x8xf32>
    %cst_49 = arith.constant dense<0.000000e+00> : vector<8x8xf32>
    %221 = vector.multi_reduction <add>, %220, %cst_49 [2] : vector<8x8x8xf32> to vector<8x8xf32>
    %222 = vector.shape_cast %221 : vector<8x8xf32> to vector<8x8x1xf32>
    %223 = tpu.reciprocal %222 {approx = true} : vector<8x8x1xf32> -> vector<8x8x1xf32>
    %224 = vector.broadcast %223 : vector<8x8x1xf32> to vector<8x8x8xf32>
    %225 = arith.mulf %220, %224 : vector<8x8x8xf32>
    "tpu.trace_start"() <{level = 10 : i32, message = "gqk,gkd->gqd"}> : () -> ()
    %cst_50 = arith.constant dense<0.000000e+00> : vector<8x8x8xf32>
    %226 = tpu.matmul %225, %214, %cst_50 {dimension_numbers = #tpu.dot_dimension_numbers<[2], [1], [1], [2], [0, 0, 0, 1, 1, 2], [0], [0]>} : vector<8x8x8xf32>, vector<8x8x8xf32>, vector<8x8x8xf32> -> vector<8x8x8xf32>
    "tpu.trace_stop"() : () -> ()
    %227 = vector.shape_cast %226 : vector<8x8x8xf32> to vector<4x16x8xf32>
    %228 = vector.extract_strided_slice %227 {offsets = [0, 0, 0], sizes = [1, 16, 8], strides = [1, 1, 1]} : vector<4x16x8xf32> to vector<1x16x8xf32>
    %229 = vector.shape_cast %228 : vector<1x16x8xf32> to vector<16x8xf32>
    %230 = vector.extract_strided_slice %227 {offsets = [1, 0, 0], sizes = [1, 16, 8], strides = [1, 1, 1]} : vector<4x16x8xf32> to vector<1x16x8xf32>
    %231 = vector.shape_cast %230 : vector<1x16x8xf32> to vector<16x8xf32>
    %232 = vector.extract_strided_slice %227 {offsets = [2, 0, 0], sizes = [1, 16, 8], strides = [1, 1, 1]} : vector<4x16x8xf32> to vector<1x16x8xf32>
    %233 = vector.shape_cast %232 : vector<1x16x8xf32> to vector<16x8xf32>
    %234 = vector.extract_strided_slice %227 {offsets = [3, 0, 0], sizes = [1, 16, 8], strides = [1, 1, 1]} : vector<4x16x8xf32> to vector<1x16x8xf32>
    %235 = vector.shape_cast %234 : vector<1x16x8xf32> to vector<16x8xf32>
    %236 = tpu.concatenate %229, %231, %233, %235 in 1 : vector<16x8xf32>, vector<16x8xf32>, vector<16x8xf32>, vector<16x8xf32> -> vector<16x32xf32>
    %c1_51 = arith.constant 1 : index
    %c32_52 = arith.constant 32 : index
    %c0_53 = arith.constant 0 : index
    %237 = vector.load %arg1[%c1_51, %c32_52, %c0_53] : memref<2x224x128xf32, #tpu.memory_space<vmem>>, vector<1x32x128xf32>
    %238 = vector.shape_cast %237 : vector<1x32x128xf32> to vector<32x128xf32>
    %cst_54 = arith.constant dense<0.000000e+00> : vector<16x128xf32>
    %239 = tpu.matmul %236, %238, %cst_54 {dimension_numbers = #tpu.dot_dimension_numbers<[1], [0], [0], [1], [0, 0, 1, 1], [], []>} : vector<16x32xf32>, vector<32x128xf32>, vector<16x128xf32> -> vector<16x128xf32>
    %240 = vector.extract_strided_slice %239 {offsets = [0, 0], sizes = [16, 32], strides = [1, 1]} : vector<16x128xf32> to vector<16x32xf32>
    %241 = vector.broadcast %151 : vector<1x32xf32> to vector<16x32xf32>
    %242 = arith.addf %240, %241 : vector<16x32xf32>
    %243 = arith.addf %145, %242 : vector<16x32xf32>
    %cst_55 = arith.constant dense<0.000000e+00> : vector<16xf32>
    %244 = vector.multi_reduction <add>, %243, %cst_55 [1] : vector<16x32xf32> to vector<16xf32>
    %245 = vector.shape_cast %244 : vector<16xf32> to vector<16x1xf32>
    %cst_56 = arith.constant 3.200000e+01 : f32
    %246 = vector.broadcast %cst_56 : f32 to vector<16x1xf32>
    %247 = arith.divf %245, %246 : vector<16x1xf32>
    %248 = vector.broadcast %247 : vector<16x1xf32> to vector<16x32xf32>
    %249 = arith.subf %243, %248 : vector<16x32xf32>
    %250 = arith.mulf %249, %249 : vector<16x32xf32>
    %cst_57 = arith.constant dense<0.000000e+00> : vector<16xf32>
    %251 = vector.multi_reduction <add>, %250, %cst_57 [1] : vector<16x32xf32> to vector<16xf32>
    %252 = vector.shape_cast %251 : vector<16xf32> to vector<16x1xf32>
    %cst_58 = arith.constant 3.200000e+01 : f32
    %253 = vector.broadcast %cst_58 : f32 to vector<16x1xf32>
    %254 = arith.divf %252, %253 : vector<16x1xf32>
    %255 = vector.broadcast %247 : vector<16x1xf32> to vector<16x32xf32>
    %256 = arith.subf %243, %255 : vector<16x32xf32>
    %cst_59 = arith.constant 9.99999974E-6 : f32
    %257 = vector.broadcast %cst_59 : f32 to vector<16x1xf32>
    %258 = arith.addf %254, %257 : vector<16x1xf32>
    %259 = math.rsqrt %258 : vector<16x1xf32>
    %260 = vector.broadcast %259 : vector<16x1xf32> to vector<16x32xf32>
    %261 = arith.mulf %256, %260 : vector<16x32xf32>
    %262 = vector.broadcast %152 : vector<1x32xf32> to vector<16x32xf32>
    %263 = arith.mulf %261, %262 : vector<16x32xf32>
    %264 = vector.broadcast %153 : vector<1x32xf32> to vector<16x32xf32>
    %265 = arith.addf %263, %264 : vector<16x32xf32>
    %c1_60 = arith.constant 1 : index
    %c64_61 = arith.constant 64 : index
    %c0_62 = arith.constant 0 : index
    %266 = vector.load %arg1[%c1_60, %c64_61, %c0_62] : memref<2x224x128xf32, #tpu.memory_space<vmem>>, vector<1x32x128xf32>
    %267 = vector.shape_cast %266 : vector<1x32x128xf32> to vector<32x128xf32>
    %cst_63 = arith.constant dense<0.000000e+00> : vector<16x128xf32>
    %268 = tpu.matmul %265, %267, %cst_63 {dimension_numbers = #tpu.dot_dimension_numbers<[1], [0], [0], [1], [0, 0, 1, 1], [], []>} : vector<16x32xf32>, vector<32x128xf32>, vector<16x128xf32> -> vector<16x128xf32>
    %269 = vector.broadcast %154 : vector<1x128xf32> to vector<16x128xf32>
    %270 = arith.addf %268, %269 : vector<16x128xf32>
    %cst_64 = arith.constant 5.000000e-01 : f32
    %271 = vector.broadcast %cst_64 : f32 to vector<16x128xf32>
    %272 = arith.mulf %271, %270 : vector<16x128xf32>
    %cst_65 = arith.constant 4.471500e-02 : f32
    %273 = vector.broadcast %cst_65 : f32 to vector<16x128xf32>
    %274 = arith.mulf %273, %270 : vector<16x128xf32>
    %275 = arith.mulf %274, %270 : vector<16x128xf32>
    %276 = arith.mulf %275, %270 : vector<16x128xf32>
    %277 = arith.addf %270, %276 : vector<16x128xf32>
    %cst_66 = arith.constant 0.797884583 : f32
    %278 = vector.broadcast %cst_66 : f32 to vector<16x128xf32>
    %279 = arith.mulf %278, %277 : vector<16x128xf32>
    %280 = math.tanh %279 : vector<16x128xf32>
    %cst_67 = arith.constant 1.000000e+00 : f32
    %281 = vector.broadcast %cst_67 : f32 to vector<16x128xf32>
    %282 = arith.addf %281, %280 : vector<16x128xf32>
    %283 = arith.mulf %272, %282 : vector<16x128xf32>
    %c1_68 = arith.constant 1 : index
    %c96_69 = arith.constant 96 : index
    %c0_70 = arith.constant 0 : index
    %284 = vector.load %arg1[%c1_68, %c96_69, %c0_70] : memref<2x224x128xf32, #tpu.memory_space<vmem>>, vector<1x128x128xf32>
    %285 = vector.shape_cast %284 : vector<1x128x128xf32> to vector<128x128xf32>
    %cst_71 = arith.constant dense<0.000000e+00> : vector<16x128xf32>
    %286 = tpu.matmul %283, %285, %cst_71 {dimension_numbers = #tpu.dot_dimension_numbers<[1], [0], [0], [1], [0, 0, 1, 1], [], []>} : vector<16x128xf32>, vector<128x128xf32>, vector<16x128xf32> -> vector<16x128xf32>
    %287 = vector.extract_strided_slice %286 {offsets = [0, 0], sizes = [16, 32], strides = [1, 1]} : vector<16x128xf32> to vector<16x32xf32>
    %288 = vector.broadcast %155 : vector<1x32xf32> to vector<16x32xf32>
    %289 = arith.addf %287, %288 : vector<16x32xf32>
    %290 = arith.addf %243, %289 : vector<16x32xf32>
    %c0_72 = arith.constant 0 : index
    %c0_73 = arith.constant 0 : index
    %291 = vector.load %arg3[%c0_72, %c0_73] : memref<16x32xf32, #tpu.memory_space<vmem>>, vector<16x32xf32>
    tpu.vector_store %arg3[%c0_72, %c0_73], %290 {strides = array<i32>} : memref<16x32xf32, #tpu.memory_space<vmem>>, vector<16x32xf32>,
    return
  }
}

</mosaic_0001>

<bundles_post_ra>
// kernel: transformer_forward.1
= control target key start
LH: loop header
LB: loop body
LE: loop exit
PB: predicated region body
PF: predicated region fallthrough
CT: control target
= control target key end

     0   :  { %8 = vsyncpa [#allocation3], 0  ;;  %s4431_s12 = smov [#allocation2]   ;;  %s4994_s0 = inlined_call_operand.vmem [shape: f32[16,32], index: 0, kind: input, shape index: {}]   ;;  %s4995_s1 = inlined_call_operand.hbm [shape: f32[2,224,128], index: 1, kind: input, shape index: {}]   ;;  %s4996_s2 = inlined_call_operand.vmem [shape: f32[2,8,128], index: 2, kind: input, shape index: {}]   ;;  %s4997_s3 = inlined_call_operand.vmem [shape: f32[16,32], index: 3, kind: output, shape index: {}]  }
   0x1   :  { %s16_s13 = sshll.u32 %s4431_s12, 4  ;;  %s4407_s16 = scalar_lea.hbm %s4995_s1, 7168  ;;  %s17_s13 = int_to_ptr.vmem [resolvable:$true] %s16_s13 }
   0x2   :  { %p4408_p0 = scmp.ne.s32.totalorder %s4995_s1, %s4407_s16  ;;  %p4411_p1 = scmp.lt.u32.totalorder %s4407_s16, %s4995_s1 }
   0x4   :  { %p4413_p2 = pnand %p4411_p1, %p4408_p0 }
   0x6   :  { %4416 = shalt.err (!%p4413_p2)
}
   0x7   :  { %s4417_s21 = scalar_lea.vmem %s17_s13, 7168  ;;  %p4422_p4 = scmp.lt.s32.totalorder %s17_s13, %s17_s13 }
   0x8   :  { %p4418_p3 = scmp.ne.s32.totalorder %s17_s13, %s4417_s21  ;;  %p4423_p5 = scmp.lt.s32.totalorder %s4417_s21, %s4417_s21 }
   0xa   :  { %p4424_p6 = por %p4423_p5, %p4422_p4 }
   0xc   :  { %p4425_p7 = pnand %p4424_p6, %p4418_p3 }
   0xe   :  { %4428 = shalt.err (!%p4425_p7)
}
   0xf   :  { %s4432_s22 = smov 128   ;;  %s4433_s23 = smov 8  }
  0x10   :  { %22 = dma.hbm_to_vmem [thread:$0]  %s4995_s1, 7168, %s17_s13, [#allocation3], %s4432_s22, %s4432_s22, %s4433_s23  }
  0x11   :  { %4429 = dma.done.wait [#allocation3], 7168  }
  0x12   :  { %4430 = vsyncadd [#allocation3], 4294960128  ;;  %vm31_vm0 = vcmask 261120   ;;  %v4479_v0 = vld [vmem:[%s4994_s0] sm:$0xff]  ;;  %v4484_v1 = vld [vmem:[%s4994_s0 + $0x8] sm:$0xff]  ;;  %v59_v22 = vlaneseq  ;;  %v4434_v43 = vmov 0.0  }
  0x13   :  { %v32_v2 = vsel %vm31_vm0, %v4479_v0, 0.0  ;;  %v35_v3 = vsel %vm31_vm0, %v4484_v1, 0.0  ;;  %v71_v14 = vld [vmem:[#allocation2] sm:$0xff]  ;;  %v72_v15 = vld [vmem:[#allocation2 + $0x8] sm:$0xff]  ;;  %v73_v16 = vld [vmem:[#allocation2 + $0x10] sm:$0xff]  ;;  %3920 = vmatprep.subr.mxu0 %v4434_v43  ;;  %vm4435_vm1 = vmmov 0  }
  0x14   :  { %33 = vadd.xlane.f32.xlu0 %v32_v2  ;;  %v4195_v17 = vpack.c.bf16 %v72_v15, %v71_v14  ;;  %v74_v18 = vld [vmem:[#allocation2 + $0x18] sm:$0xff]  ;;  %v4494_v26 = vshrl.u32 %v59_v22, 7  ;;  %v4500_v29 = vld [vmem:[%s4996_s2] sm:$0xff]  ;;  %3922 = vmatprep.mubr.msk.f32.mxu0 %vm4435_vm1, %v4434_v43  ;;  %s4436_s30 = smov 120   ;;  %s4437_s4 = smov 112   ;;  %vm192_vm2 = vcmask 64512  }
  0x15   :  { %v4199_v19 = vpack.c.bf16 %v74_v18, %v73_v16  ;;  %s4438_s5 = smov 104   ;;  %s4439_s6 = smov 96   ;;  %vm1521_vm3 = vcmask 130048   ;;  %vm1524_vm4 = vcmask 195584  }
  0x16   :  { %4196 = vmatprep.subr.bf16.mxu1 %v4195_v17  ;;  %v61_v28 = vsub.s32 0, %v4494_v26  ;;  %v67_v30 = vsub.s32 1, %v4494_v26  ;;  %v77_v41 = vsub.s32 2, %v4494_v26  ;;  %s4440_s7 = smov 64   ;;  %s4441_s8 = smov 16  }
  0x17   :  { %4198 = vmatpush3.bf16.msra.mxu1 %v4195_v17  ;;  %s4442_s9 = smov 24  }
  0x18   :  { %36 = vadd.xlane.f32.xlu0 %v35_v3  ;;  %4200 = vmatprep.subr.bf16.mxu1 %v4199_v19  ;;  %v62_v31 = vrot.slane %v4500_v29, %v61_v28  ;;  %v68_v34 = vrot.slane %v4500_v29, %v67_v30  ;;  %v78_v42 = vrot.slane %v4500_v29, %v77_v41 }
  0x1b   :  { %4202 = vmatpush3.bf16.msra.mxu1 %v4199_v19 }
  0x1c   :  { %3910 = vmatprep.subr.mxu1 %v4434_v43 }
  0xa1   :  { %v34_v4 = vpop.xlane.xlu0 %33 }
  0xa2   :  { %v39_v5 = vmul.f32 0.03125, %v34_v4 }
  0xa4   :  { %v41_v6 = vsub.f32 %v4479_v0, %v39_v5 }
  0xa5   :  { %v37_v7 = vpop.xlane.xlu0 %36 }
  0xa6   :  { %v40_v8 = vmul.f32 0.03125, %v37_v7  ;;  %v43_v9 = vmul.f32 %v41_v6, %v41_v6 }
  0xa8   :  { %v42_v10 = vsub.f32 %v4484_v1, %v40_v8  ;;  %v45_v11 = vsel %vm31_vm0, %v43_v9, 0.0 }
  0xa9   :  { %46 = vadd.xlane.f32.xlu1 %v45_v11 }
  0xaa   :  { %v44_v12 = vmul.f32 %v42_v10, %v42_v10 }
  0xac   :  { %v48_v13 = vsel %vm31_vm0, %v44_v12, 0.0 }
  0xad   :  { %49 = vadd.xlane.f32.xlu1 %v48_v13 }
 0x136   :  { %v47_v20 = vpop.xlane.xlu1 %46 }
 0x137   :  { %v51_v21 = vmul.f32 0.03125, %v47_v20 }
 0x139   :  { %v53_v23 = vadd.f32 1e-05, %v51_v21 }
 0x13a   :  { %v50_v24 = vpop.xlane.xlu1 %49 }
 0x13b   :  { %4319 = vrsqrt.f32 %v53_v23  ;;  %v52_v25 = vmul.f32 0.03125, %v50_v24 }
 0x13d   :  { %v54_v27 = vadd.f32 1e-05, %v52_v25 }
 0x13f   :  { %4321 = vrsqrt.f32 %v54_v27 }
 0x145   :  { %v4320_v32 = vpop.eup %4319 }
 0x146   :  { %v57_v33 = vmul.f32 %v4320_v32, %v41_v6 }
 0x148   :  { %v63_v35 = vmul.f32 %v62_v31, %v57_v33 }
 0x149   :  { %v4322_v36 = vpop.eup %4321 }
 0x14a   :  { %v58_v37 = vmul.f32 %v4322_v36, %v42_v10  ;;  %v69_v38 = vadd.f32 %v68_v34, %v63_v35 }
 0x14c   :  { %v64_v39 = vmul.f32 %v62_v31, %v58_v37  ;;  %3907 = vmatprep.mubr.msk.f32.mxu1 %vm31_vm0, %v69_v38 }
 0x14e   :  { %v70_v40 = vadd.f32 %v68_v34, %v64_v39 }
 0x150   :  { %3908 = vmatmul.mubr.msk.f32.vlgmr.msra.gmra.mrb[0].mxu1 %vm31_vm0, %v70_v40 }
 0x151   :  { %3912 = vmatprep.mubr.msk.f32.mxu1 %vm4435_vm1, %v4434_v43 }
 0x223   :  { %v3909_v44 = vpop.f32.mrb[0].mxu1 }
 0x224   :  { %v4521_v45 = vadd.f32 %v3909_v44, %v78_v42  ;;  %v151_v46 = vpop.f32.mrb[1].mxu1 }
 0x225   :  { %v4523_v47 = vadd.f32 %v151_v46, %v78_v42 }
 0x226   :  { %180 = vrot.lane.b32.xlu1 %v4521_v45, %s4436_s30  ;;  %v161_v49 = vmul.f32 0.35355338, %v4521_v45 }
 0x227   :  { %178 = vrot.lane.b32.xlu0 %v4523_v47, %s4436_s30  ;;  %v160_v48 = vmul.f32 0.35355338, %v4523_v47 }
 0x22a   :  { %182 = vrot.lane.b32.xlu1 %v4523_v47, %s4437_s4 }
 0x22b   :  { %186 = vrot.lane.b32.xlu0 %v4523_v47, %s4438_s5 }
 0x22e   :  { %184 = vrot.lane.b32.xlu1 %v4521_v45, %s4437_s4 }
 0x22f   :  { %190 = vrot.lane.b32.xlu0 %v4523_v47, %s4439_s6 }
 0x232   :  { %188 = vrot.lane.b32.xlu1 %v4521_v45, %s4438_s5 }
 0x233   :  { %164 = vrot.lane.b32.xlu0 %v160_v48, %s4436_s30 }
 0x236   :  { %267 = vrot.lane.b32.xlu1 %v4521_v45, %s4439_s6 }
 0x237   :  { %168 = vrot.lane.b32.xlu0 %v160_v48, %s4437_s4 }
 0x23a   :  { %166 = vrot.lane.b32.xlu1 %v161_v49, %s4436_s30 }
 0x23e   :  { %170 = vrot.lane.b32.xlu1 %v161_v49, %s4437_s4 }
 0x298   :  { %v4547_v50 = vpop.permute.xlu1 %180 }
 0x299   :  { %419 = vrot.lane.b32.xlu1 %v4547_v50, %s4439_s6  ;;  %v4551_v51 = vpop.permute.xlu0 %178 }
 0x29a   :  { %343 = vrot.lane.b32.xlu0 %v4551_v51, %s4439_s6 }
 0x29c   :  { %v4555_v52 = vpop.permute.xlu1 %182 }
 0x29d   :  { %v4557_v53 = vpop.permute.xlu0 %186 }
 0x29e   :  { %495 = vrot.lane.b32.xlu0 %v4555_v52, %s4439_s6 }
 0x2a0   :  { %v4561_v54 = vpop.permute.xlu1 %184 }
 0x2a1   :  { %571 = vrot.lane.b32.xlu1 %v4561_v54, %s4439_s6  ;;  %v191_v55 = vpop.permute.xlu0 %190 }
 0x2a2   :  { %3911 = vmatpush3.xpose.msk.msra.mxu1 %vm192_vm2, %v191_v55  ;;  %647 = vrot.lane.b32.xlu0 %v4557_v53, %s4439_s6 }
 0x2a3   :  { %3915 = vmatprep.subr.mxu1 %v4434_v43 }
 0x2a4   :  { %v4569_v56 = vpop.permute.xlu1 %188 }
 0x2a5   :  { %723 = vrot.lane.b32.xlu1 %v4569_v56, %s4439_s6  ;;  %3913 = vmatmul.mubr.msk.f32.vlgmr.msra.gmra.mrb[2].mxu1 %vm192_vm2, %v160_v48  ;;  %v165_v59 = vpop.permute.xlu0 %164 }
 0x2a6   :  { %172 = vrot.lane.b32.xlu0 %v160_v48, %s4438_s5  ;;  %3917 = vmatprep.mubr.msk.f32.mxu1 %vm4435_vm1, %v4434_v43 }
 0x2a8   :  { %v268_v57 = vpop.permute.xlu1 %267 }
 0x2a9   :  { %174 = vrot.lane.b32.xlu1 %v161_v49, %s4438_s5  ;;  %3916 = vmatpush3.xpose.msk.msra.mxu1 %vm192_vm2, %v268_v57  ;;  %v169_v61 = vpop.permute.xlu0 %168 }
 0x2aa   :  { %3925 = vmatprep.subr.mxu1 %v4434_v43 }
 0x2ac   :  { %3918 = vmatmul.mubr.msk.f32.vlgmr.msra.gmra.mrb[4].mxu1 %vm192_vm2, %v161_v49  ;;  %v167_v58 = vpop.permute.xlu1 %166 }
 0x2ad   :  { %3927 = vmatprep.mubr.msk.f32.mxu1 %vm4435_vm1, %v4434_v43 }
 0x2b0   :  { %v171_v60 = vpop.permute.xlu1 %170 }
 0x30b   :  { %v420_v62 = vpop.permute.xlu1 %419 }
 0x30c   :  { %v344_v63 = vpop.permute.xlu0 %343  ;;  %3926 = vmatpush3.xpose.msk.msra.mxu1 %vm192_vm2, %v420_v62 }
 0x30d   :  { %3921 = vmatpush3.xpose.msk.msra.mxu0 %vm192_vm2, %v344_v63  ;;  %3935 = vmatprep.subr.mxu1 %v4434_v43 }
 0x30e   :  { %3930 = vmatprep.subr.mxu0 %v4434_v43 }
 0x30f   :  { %3928 = vmatmul.mubr.msk.f32.vlgmr.msra.gmra.mrb[6].mxu1 %vm192_vm2, %v167_v58 }
 0x310   :  { %3923 = vmatmul.mubr.msk.f32.vlgmr.msra.gmra.mrb[0].mxu0 %vm192_vm2, %v165_v59  ;;  %v496_v2 = vpop.permute.xlu0 %495  ;;  %3937 = vmatprep.mubr.msk.f32.mxu1 %vm4435_vm1, %v4434_v43 }
 0x311   :  { %3931 = vmatpush3.xpose.msk.msra.mxu0 %vm192_vm2, %v496_v2  ;;  %3932 = vmatprep.mubr.msk.f32.mxu0 %vm4435_vm1, %v4434_v43 }
 0x312   :  { %3940 = vmatprep.subr.mxu0 %v4434_v43 }
 0x313   :  { %v572_v3 = vpop.permute.xlu1 %571 }
 0x314   :  { %3933 = vmatmul.mubr.msk.f32.vlgmr.msra.gmra.mrb[2].mxu0 %vm192_vm2, %v169_v61  ;;  %v648_v4 = vpop.permute.xlu0 %647  ;;  %3936 = vmatpush3.xpose.msk.msra.mxu1 %vm192_vm2, %v572_v3 }
 0x315   :  { %3941 = vmatpush3.xpose.msk.msra.mxu0 %vm192_vm2, %v648_v4  ;;  %3945 = vmatprep.subr.mxu1 %v4434_v43 }
 0x316   :  { %3942 = vmatprep.mubr.msk.f32.mxu0 %vm4435_vm1, %v4434_v43  ;;  %3950 = vmatprep.subr.mxu0 %v4434_v43 }
 0x317   :  { %v724_v5 = vpop.permute.xlu1 %723  ;;  %3938 = vmatmul.mubr.msk.f32.vlgmr.msra.gmra.mrb[8].mxu1 %vm192_vm2, %v171_v60 }
 0x318   :  { %v173_v6 = vpop.permute.xlu0 %172  ;;  %3946 = vmatpush3.xpose.msk.msra.mxu1 %vm192_vm2, %v724_v5  ;;  %3947 = vmatprep.mubr.msk.f32.mxu1 %vm4435_vm1, %v4434_v43 }
 0x319   :  { %3943 = vmatmul.mubr.msk.f32.vlgmr.msra.gmra.mrb[4].mxu0 %vm192_vm2, %v173_v6  ;;  %3955 = vmatprep.subr.mxu1 %v4434_v43 }
 0x31a   :  { %3952 = vmatprep.mubr.msk.f32.mxu0 %vm4435_vm1, %v4434_v43 }
 0x31b   :  { %v175_v7 = vpop.permute.xlu1 %174 }
 0x31c   :  { %3948 = vmatmul.mubr.msk.f32.vlgmr.msra.gmra.mrb[10].mxu1 %vm192_vm2, %v175_v7 }
 0x31d   :  { %3957 = vmatprep.mubr.msk.f32.mxu1 %vm4435_vm1, %v4434_v43 }
 0x378   :  { %v263_v8 = vpop.f32.mrb[2].mxu1 }
 0x379   :  { %v3914_v9 = vpop.f32.mrb[3].mxu1  ;;  %v799_v10 = vsel %vm192_vm2, %v263_v8, -inf }
 0x37a   :  { %800 = vmax.xlane.f32.xlu0 %v799_v10 }
 0x37f   :  { %v339_v11 = vpop.f32.mrb[4].mxu1 }
 0x380   :  { %v3919_v12 = vpop.f32.mrb[5].mxu1  ;;  %v802_v13 = vsel %vm192_vm2, %v339_v11, -inf }
 0x381   :  { %803 = vmax.xlane.f32.xlu1 %v802_v13 }
 0x3e2   :  { %v491_v14 = vpop.f32.mrb[6].mxu1 }
 0x3e3   :  { %v415_v15 = vpop.f32.mrb[0].mxu0  ;;  %v3929_v16 = vpop.f32.mrb[7].mxu1  ;;  %v808_v17 = vsel %vm192_vm2, %v491_v14, -inf }
 0x3e4   :  { %v3924_v18 = vpop.f32.mrb[1].mxu0  ;;  %809 = vmax.xlane.f32.xlu0 %v808_v17  ;;  %v805_v20 = vsel %vm192_vm2, %v415_v15, -inf }
 0x3e7   :  { %v567_v19 = vpop.f32.mrb[2].mxu0 }
 0x3e8   :  { %v3934_v21 = vpop.f32.mrb[3].mxu0  ;;  %806 = vmax.xlane.f32.xlu0 %v805_v20  ;;  %v811_v24 = vsel %vm192_vm2, %v567_v19, -inf }
 0x3ea   :  { %v643_v22 = vpop.f32.mrb[8].mxu1 }
 0x3eb   :  { %v3939_v23 = vpop.f32.mrb[9].mxu1  ;;  %v814_v25 = vsel %vm192_vm2, %v643_v22, -inf }
 0x3ec   :  { %v719_v27 = vpop.f32.mrb[4].mxu0  ;;  %812 = vmax.xlane.f32.xlu0 %v811_v24  ;;  %815 = vmax.xlane.f32.xlu1 %v814_v25 }
 0x3ed   :  { %v3944_v31 = vpop.f32.mrb[5].mxu0  ;;  %v817_v33 = vsel %vm192_vm2, %v719_v27, -inf }
 0x3ef   :  { %v795_v32 = vpop.f32.mrb[10].mxu1 }
 0x3f0   :  { %818 = vmax.xlane.f32.xlu0 %v817_v33  ;;  %v3949_v34 = vpop.f32.mrb[11].mxu1  ;;  %v820_v35 = vsel %vm192_vm2, %v795_v32, -inf }
 0x3f1   :  { %821 = vmax.xlane.f32.xlu1 %v820_v35 }
 0x402   :  { %963 = vrot.lane.b32.xlu1 %v4521_v45, %s4440_s7 }
 0x406   :  { %887 = vrot.lane.b32.xlu0 %v4523_v47, %s4440_s7  ;;  %1039 = vrot.lane.b32.xlu1 %v4551_v51, %s4440_s7 }
 0x407   :  { %v801_v36 = vpop.xlane.xlu0 %800 }
 0x408   :  { %v823_v37 = vsub.f32 %v263_v8, %v801_v36 }
 0x40a   :  { %1191 = vrot.lane.b32.xlu0 %v4555_v52, %s4440_s7  ;;  %1115 = vrot.lane.b32.xlu1 %v4547_v50, %s4440_s7  ;;  %v831_v38 = vmul.f32 1.442695, %v823_v37 }
 0x40c   :  { %4323 = vpow2.f32 %v831_v38 }
 0x40e   :  { %1267 = vrot.lane.b32.xlu1 %v4561_v54, %s4440_s7  ;;  %v804_v39 = vpop.xlane.xlu1 %803 }
 0x40f   :  { %v824_v40 = vsub.f32 %v339_v11, %v804_v39 }
 0x411   :  { %v833_v42 = vmul.f32 1.442695, %v824_v40 }
 0x413   :  { %4325 = vpow2.f32 %v833_v42 }
 0x416   :  { %v4633_v44 = vpop.eup %4323 }
 0x417   :  { %v847_v45 = vsel %vm192_vm2, %v4633_v44, 0.0 }
 0x41d   :  { %v4637_v46 = vpop.eup %4325 }
 0x41e   :  { %v850_v47 = vsel %vm192_vm2, %v4637_v46, 0.0 }
 0x429   :  { %848 = vadd.xlane.f32.xlu0 %v847_v45 }
 0x432   :  { %851 = vadd.xlane.f32.xlu1 %v850_v47 }
 0x471   :  { %v810_v48 = vpop.xlane.xlu0 %809 }
 0x472   :  { %v826_v49 = vsub.f32 %v491_v14, %v810_v48 }
 0x474   :  { %v837_v50 = vmul.f32 1.442695, %v826_v49 }
 0x475   :  { %v807_v51 = vpop.xlane.xlu0 %806 }
 0x476   :  { %4327 = vpow2.f32 %v837_v50  ;;  %v825_v52 = vsub.f32 %v415_v15, %v807_v51 }
 0x478   :  { %v835_v54 = vmul.f32 1.442695, %v825_v52 }
 0x479   :  { %v813_v55 = vpop.xlane.xlu0 %812  ;;  %v816_v57 = vpop.xlane.xlu1 %815 }
 0x47a   :  { %4329 = vpow2.f32 %v835_v54  ;;  %v827_v58 = vsub.f32 %v567_v19, %v813_v55  ;;  %v828_v59 = vsub.f32 %v643_v22, %v816_v57 }
 0x47c   :  { %v839_v60 = vmul.f32 1.442695, %v827_v58  ;;  %v841_v61 = vmul.f32 1.442695, %v828_v59 }
 0x47d   :  { %v819_v62 = vpop.xlane.xlu0 %818 }
 0x47e   :  { %4331 = vpow2.f32 %v839_v60  ;;  %v829_v63 = vsub.f32 %v719_v27, %v819_v62  ;;  %v822_v2 = vpop.xlane.xlu1 %821  ;;  %v1527_v60 = vld [vmem:[#allocation2 + $0x20] sm:$0xff] }
 0x47f   :  { %4333 = vpow2.f32 %v841_v61  ;;  %v830_v3 = vsub.f32 %v795_v32, %v822_v2  ;;  %v1528_v61 = vld [vmem:[#allocation2 + $0x28] sm:$0xff]  ;;  %v1530_v2 = vld [vmem:[#allocation2 + $0x38] sm:$0xff] }
 0x480   :  { %v4328_v4 = vpop.eup %4327  ;;  %v843_v5 = vmul.f32 1.442695, %v829_v63  ;;  %v4203_v62 = vpack.c.bf16 %v1528_v61, %v1527_v60  ;;  %v1529_v63 = vld [vmem:[#allocation2 + $0x30] sm:$0xff] }
 0x481   :  { %v845_v6 = vmul.f32 1.442695, %v830_v3  ;;  %v888_v7 = vpop.permute.xlu0 %887  ;;  %v856_v8 = vsel %vm192_vm2, %v4328_v4, 0.0  ;;  %v4207_v3 = vpack.c.bf16 %v1530_v2, %v1529_v63 }
 0x482   :  { %4335 = vpow2.f32 %v843_v5  ;;  %3951 = vmatpush3.msra.mxu0 %v888_v7  ;;  %857 = vadd.xlane.f32.xlu1 %v856_v8  ;;  %v964_v9 = vpop.permute.xlu1 %963 }
 0x483   :  { %4337 = vpow2.f32 %v845_v6  ;;  %3956 = vmatpush3.msra.mxu1 %v964_v9  ;;  %3960 = vmatprep.subr.mxu0 %v4434_v43 }
 0x484   :  { %v4330_v10 = vpop.eup %4329  ;;  %3965 = vmatprep.subr.mxu1 %v4434_v43 }
 0x485   :  { %v853_v11 = vsel %vm192_vm2, %v4330_v10, 0.0  ;;  %v1192_v21 = vpop.permute.xlu0 %1191 }
 0x486   :  { %854 = vadd.xlane.f32.xlu0 %v853_v11  ;;  %v1040_v20 = vpop.permute.xlu1 %1039 }
 0x488   :  { %v4332_v12 = vpop.eup %4331 }
 0x489   :  { %v4334_v13 = vpop.eup %4333  ;;  %v859_v14 = vsel %vm192_vm2, %v4332_v12, 0.0 }
 0x48a   :  { %860 = vadd.xlane.f32.xlu0 %v859_v14  ;;  %v862_v15 = vsel %vm192_vm2, %v4334_v13, 0.0  ;;  %v1116_v22 = vpop.permute.xlu1 %1115 }
 0x48b   :  { %863 = vadd.xlane.f32.xlu1 %v862_v15 }
 0x48c   :  { %v4647_v16 = vpop.eup %4335 }
 0x48d   :  { %v4649_v17 = vpop.eup %4337  ;;  %v865_v18 = vsel %vm192_vm2, %v4647_v16, 0.0 }
 0x48e   :  { %866 = vadd.xlane.f32.xlu0 %v865_v18  ;;  %v868_v19 = vsel %vm192_vm2, %v4649_v17, 0.0  ;;  %v1268_v24 = vpop.permute.xlu1 %1267 }
 0x48f   :  { %869 = vadd.xlane.f32.xlu1 %v868_v19 }
 0x4a0   :  { %1419 = vrot.lane.b32.xlu1 %v4569_v56, %s4440_s7 }
 0x4a4   :  { %1343 = vrot.lane.b32.xlu0 %v4557_v53, %s4440_s7 }
 0x4b6   :  { %v849_v23 = vpop.xlane.xlu0 %848 }
 0x4b7   :  { %4339 = vrcp.f32 %v849_v23 }
 0x4bf   :  { %v852_v25 = vpop.xlane.xlu1 %851 }
 0x4c0   :  { %4341 = vrcp.f32 %v852_v25 }
 0x4c1   :  { %v4340_v27 = vpop.eup %4339 }
 0x4c2   :  { %v879_v31 = vmul.f32 %v4340_v27, %v4633_v44 }
 0x4c4   :  { %3953 = vmatmul.mubr.msk.f32.vlgmr.msra.gmra.mrb[6].mxu0 %vm192_vm2, %v879_v31 }
 0x4c5   :  { %3961 = vmatpush3.msra.mxu0 %v1040_v20  ;;  %3962 = vmatprep.mubr.msk.f32.mxu0 %vm4435_vm1, %v4434_v43 }
 0x4c6   :  { %3970 = vmatprep.subr.mxu0 %v4434_v43 }
 0x4ca   :  { %v4342_v53 = vpop.eup %4341 }
 0x4cb   :  { %v880_v56 = vmul.f32 %v4342_v53, %v4637_v46  ;;  %v1614_v53 = vsub.s32 3, %v4494_v26 }
 0x4cd   :  { %3958 = vmatmul.mubr.msk.f32.vlgmr.msra.gmra.mrb[12].mxu1 %vm192_vm2, %v880_v56  ;;  %v1615_v56 = vrot.slane %v4500_v29, %v1614_v53 }
 0x4ce   :  { %3966 = vmatpush3.msra.mxu1 %v1116_v22  ;;  %3967 = vmatprep.mubr.msk.f32.mxu1 %vm4435_vm1, %v4434_v43 }
 0x4cf   :  { %3975 = vmatprep.subr.mxu1 %v4434_v43 }
 0x50f   :  { %v858_v32 = vpop.xlane.xlu1 %857 }
 0x510   :  { %4343 = vrcp.f32 %v858_v32 }
 0x513   :  { %v855_v33 = vpop.xlane.xlu0 %854 }
 0x514   :  { %4345 = vrcp.f32 %v855_v33 }
 0x517   :  { %v861_v34 = vpop.xlane.xlu0 %860 }
 0x518   :  { %4347 = vrcp.f32 %v861_v34  ;;  %v864_v35 = vpop.xlane.xlu1 %863 }
 0x519   :  { %4349 = vrcp.f32 %v864_v35 }
 0x51a   :  { %v4344_v36 = vpop.eup %4343 }
 0x51b   :  { %v882_v37 = vmul.f32 %v4344_v36, %v4328_v4  ;;  %v867_v38 = vpop.xlane.xlu0 %866 }
 0x51c   :  { %4351 = vrcp.f32 %v867_v38  ;;  %v870_v39 = vpop.xlane.xlu1 %869 }
 0x51d   :  { %4353 = vrcp.f32 %v870_v39  ;;  %3968 = vmatmul.mubr.msk.f32.vlgmr.msra.gmra.mrb[14].mxu1 %vm192_vm2, %v882_v37 }
 0x51e   :  { %v4346_v40 = vpop.eup %4345  ;;  %3976 = vmatpush3.msra.mxu1 %v1268_v24  ;;  %3977 = vmatprep.mubr.msk.f32.mxu1 %vm4435_vm1, %v4434_v43 }
 0x51f   :  { %v881_v42 = vmul.f32 %v4346_v40, %v4330_v10  ;;  %3985 = vmatprep.subr.mxu1 %v4434_v43  ;;  %v1344_v48 = vpop.permute.xlu0 %1343 }
 0x520   :  { %v1420_v50 = vpop.permute.xlu1 %1419 }
 0x521   :  { %3963 = vmatmul.mubr.msk.f32.vlgmr.msra.gmra.mrb[8].mxu0 %vm192_vm2, %v881_v42 }
 0x522   :  { %v4348_v44 = vpop.eup %4347  ;;  %3971 = vmatpush3.msra.mxu0 %v1192_v21  ;;  %3972 = vmatprep.mubr.msk.f32.mxu0 %vm4435_vm1, %v4434_v43 }
 0x523   :  { %v4350_v45 = vpop.eup %4349  ;;  %v883_v46 = vmul.f32 %v4348_v44, %v4332_v12  ;;  %3980 = vmatprep.subr.mxu0 %v4434_v43 }
 0x524   :  { %v884_v47 = vmul.f32 %v4350_v45, %v4334_v13 }
 0x525   :  { %3973 = vmatmul.mubr.msk.f32.vlgmr.msra.gmra.mrb[10].mxu0 %vm192_vm2, %v883_v46 }
 0x526   :  { %v4352_v49 = vpop.eup %4351  ;;  %3978 = vmatmul.mubr.msk.f32.vlgmr.msra.gmra.mrb[16].mxu1 %vm192_vm2, %v884_v47  ;;  %3981 = vmatpush3.msra.mxu0 %v1344_v48 }
 0x527   :  { %v4354_v51 = vpop.eup %4353  ;;  %v885_v52 = vmul.f32 %v4352_v49, %v4647_v16  ;;  %3986 = vmatpush3.msra.mxu1 %v1420_v50  ;;  %3982 = vmatprep.mubr.msk.f32.mxu0 %vm4435_vm1, %v4434_v43  ;;  %v1658_v50 = vld [vmem:[#allocation2 + $0x40] sm:$0xff] }
 0x528   :  { %v886_v54 = vmul.f32 %v4354_v51, %v4649_v17  ;;  %3987 = vmatprep.mubr.msk.f32.mxu1 %vm4435_vm1, %v4434_v43  ;;  %4204 = vmatprep.subr.bf16.mxu1 %v4203_v62  ;;  %v1659_v51 = vld [vmem:[#allocation2 + $0x48] sm:$0xff] }
 0x529   :  { %3983 = vmatmul.mubr.msk.f32.vlgmr.msra.gmra.mrb[12].mxu0 %vm192_vm2, %v885_v52  ;;  %v4211_v52 = vpack.c.bf16 %v1659_v51, %v1658_v50 }
 0x52a   :  { %3988 = vmatmul.mubr.msk.f32.vlgmr.msra.gmra.mrb[18].mxu1 %vm192_vm2, %v886_v54  ;;  %v1660_v54 = vld [vmem:[#allocation2 + $0x50] sm:$0xff] }
 0x52b   :  { %4206 = vmatpush3.bf16.msra.mxu1 %v4203_v62 }
 0x52c   :  { %4208 = vmatprep.subr.bf16.mxu1 %v4207_v3 }
 0x52f   :  { %4210 = vmatpush3.bf16.msra.mxu1 %v4207_v3 }
 0x530   :  { %4212 = vmatprep.subr.bf16.mxu1 %v4211_v52 }
 0x597   :  { %v959_v55 = vpop.f32.mrb[6].mxu0 }
 0x598   :  { %v3954_v57 = vpop.f32.mrb[7].mxu0 }
 0x5a0   :  { %v1035_v58 = vpop.f32.mrb[12].mxu1 }
 0x5a1   :  { %v3959_v59 = vpop.f32.mrb[13].mxu1 }
 0x5a2   :  { %v1766_v59 = vld [vmem:[#allocation2 + $0x68] sm:$0xff] }
 0x5f0   :  { %v1187_v4 = vpop.f32.mrb[14].mxu1 }
 0x5f1   :  { %1499 = vrot.lane.b32.xlu1 %v1187_v4, %s4433_s23  ;;  %v3969_v5 = vpop.f32.mrb[15].mxu1 }
 0x5f2   :  { %v1648_v5 = vsub.s32 4, %v4494_v26 }
 0x5f4   :  { %v1111_v6 = vpop.f32.mrb[8].mxu0 }
 0x5f5   :  { %1497 = vrot.lane.b32.xlu0 %v1111_v6, %s4433_s23  ;;  %v3964_v7 = vpop.f32.mrb[9].mxu0  ;;  %v1654_v6 = vsub.s32 5, %v4494_v26 }
 0x5f6   :  { %v1649_v7 = vrot.slane %v4500_v29, %v1648_v5 }
 0x5f8   :  { %v1263_v8 = vpop.f32.mrb[10].mxu0 }
 0x5f9   :  { %v1339_v9 = vpop.f32.mrb[16].mxu1  ;;  %1505 = vrot.lane.b32.xlu0 %v1263_v8, %s4441_s8  ;;  %v3974_v10 = vpop.f32.mrb[11].mxu0 }
 0x5fa   :  { %1507 = vrot.lane.b32.xlu1 %v1339_v9, %s4441_s8  ;;  %v3979_v11 = vpop.f32.mrb[17].mxu1  ;;  %v1655_v10 = vrot.slane %v4500_v29, %v1654_v6 }
 0x5fc   :  { %v1415_v12 = vpop.f32.mrb[12].mxu0 }
 0x5fd   :  { %1513 = vrot.lane.b32.xlu0 %v1415_v12, %s4442_s9  ;;  %v3984_v13 = vpop.f32.mrb[13].mxu0  ;;  %v1491_v14 = vpop.f32.mrb[18].mxu1 }
 0x5fe   :  { %1515 = vrot.lane.b32.xlu1 %v1491_v14, %s4442_s9  ;;  %v3989_v15 = vpop.f32.mrb[19].mxu1 }
 0x663   :  { %v1500_v17 = vpop.permute.xlu1 %1499 }
 0x664   :  { %v1520_v21 = vsel %vm192_vm2, %v1035_v58, %v1500_v17  ;;  %v1765_v58 = vld [vmem:[#allocation2 + $0x60] sm:$0xff]  ;;  %v1767_v17 = vld [vmem:[#allocation2 + $0x70] sm:$0xff] }
 0x665   :  { %v4219_v60 = vpack.c.bf16 %v1766_v59, %v1765_v58 }
 0x667   :  { %v1498_v16 = vpop.permute.xlu0 %1497  ;;  %4220 = vmatprep.subr.bf16.mxu0 %v4219_v60 }
 0x668   :  { %v1519_v20 = vsel %vm192_vm2, %v959_v55, %v1498_v16  ;;  %v1661_v55 = vld [vmem:[#allocation2 + $0x58] sm:$0xff]  ;;  %4222 = vmatpush3.bf16.msra.mxu0 %v4219_v60 }
 0x669   :  { %v4215_v57 = vpack.c.bf16 %v1661_v55, %v1660_v54 }
 0x66b   :  { %v1506_v18 = vpop.permute.xlu0 %1505 }
 0x66c   :  { %v1508_v19 = vpop.permute.xlu1 %1507  ;;  %v1522_v22 = vsel %vm1521_vm3, %v1519_v20, %v1506_v18  ;;  %v1768_v18 = vld [vmem:[#allocation2 + $0x78] sm:$0xff]  ;;  %v1769_v20 = vld [vmem:[#allocation2 + $0x80] sm:$0xff] }
 0x66d   :  { %v1523_v24 = vsel %vm1521_vm3, %v1520_v21, %v1508_v19  ;;  %v4223_v19 = vpack.c.bf16 %v1768_v18, %v1767_v17  ;;  %v1770_v21 = vld [vmem:[#allocation2 + $0x88] sm:$0xff] }
 0x66f   :  { %v1514_v23 = vpop.permute.xlu0 %1513  ;;  %4224 = vmatprep.subr.bf16.mxu0 %v4223_v19 }
 0x670   :  { %v1525_v25 = vsel %vm1524_vm4, %v1522_v22, %v1514_v23  ;;  %v1516_v27 = vpop.permute.xlu1 %1515  ;;  %4226 = vmatpush3.bf16.msra.mxu0 %v4223_v19  ;;  %v4227_v22 = vpack.c.bf16 %v1770_v21, %v1769_v20  ;;  %v1771_v23 = vld [vmem:[#allocation2 + $0x90] sm:$0xff] }
 0x671   :  { %v1526_v31 = vsel %vm1524_vm4, %v1523_v24, %v1516_v27  ;;  %3998 = vmatprep.mubr.msk.f32.mxu1 %vm31_vm0, %v1525_v25  ;;  %v1772_v24 = vld [vmem:[#allocation2 + $0x98] sm:$0xff]  ;;  %v1773_v25 = vld [vmem:[#allocation2 + $0xa0] sm:$0xff] }
 0x672   :  { %3999 = vmatmul.mubr.msk.f32.vlgmr.msra.gmra.mrb[20].mxu1 %vm31_vm0, %v1526_v31  ;;  %4228 = vmatprep.subr.bf16.mxu0 %v4227_v22  ;;  %v4231_v27 = vpack.c.bf16 %v1772_v24, %v1771_v23  ;;  %v1774_v31 = vld [vmem:[#allocation2 + $0xa8] sm:$0xff] }
 0x673   :  { %4214 = vmatpush3.bf16.msra.mxu1 %v4211_v52 }
 0x674   :  { %4216 = vmatprep.subr.bf16.mxu1 %v4215_v57  ;;  %4230 = vmatpush3.bf16.msra.mxu0 %v4227_v22 }
 0x675   :  { %4232 = vmatprep.subr.bf16.mxu0 %v4231_v27 }
 0x677   :  { %4218 = vmatpush3.bf16.msra.mxu1 %v4215_v57 }
 0x678   :  { %4234 = vmatpush3.bf16.msra.mxu0 %v4231_v27  ;;  %v1905_v27 = vld [vmem:[#allocation2 + $0xe0] sm:$0xff] }
 0x745   :  { %v4000_v32 = vpop.f32.mrb[20].mxu1 }
 0x746   :  { %v1617_v33 = vadd.f32 %v4000_v32, %v1615_v56  ;;  %v1603_v34 = vpop.f32.mrb[21].mxu1  ;;  %v1775_v32 = vld [vmem:[#allocation2 + $0xb0] sm:$0xff] }
 0x747   :  { %v1616_v35 = vadd.f32 %v1615_v56, %v1603_v34  ;;  %v4235_v56 = vpack.c.bf16 %v1774_v31, %v1773_v25  ;;  %v1906_v31 = vld [vmem:[#allocation2 + $0xe8] sm:$0xff] }
 0x748   :  { %v4706_v36 = vadd.f32 %v1617_v33, %v4484_v1  ;;  %v1776_v33 = vld [vmem:[#allocation2 + $0xb8] sm:$0xff] }
 0x749   :  { %v4709_v37 = vadd.f32 %v1616_v35, %v4479_v0  ;;  %4236 = vmatprep.subr.bf16.mxu0 %v4235_v56  ;;  %v4239_v34 = vpack.c.bf16 %v1776_v33, %v1775_v32  ;;  %v1777_v35 = vld [vmem:[#allocation2 + $0xc0] sm:$0xff]  ;;  %v1907_v32 = vld [vmem:[#allocation2 + $0xf0] sm:$0xff]  ;;  %v1908_v33 = vld [vmem:[#allocation2 + $0xf8] sm:$0xff] }
 0x74a   :  { %v1623_v38 = vsel %vm31_vm0, %v4706_v36, 0.0  ;;  %4238 = vmatpush3.bf16.msra.mxu0 %v4235_v56  ;;  %v4251_v56 = vpack.c.bf16 %v1906_v31, %v1905_v27 }
 0x74b   :  { %1624 = vadd.xlane.f32.xlu1 %v1623_v38  ;;  %v1620_v39 = vsel %vm31_vm0, %v4709_v37, 0.0  ;;  %v1778_v38 = vld [vmem:[#allocation2 + $0xc8] sm:$0xff]  ;;  %4240 = vmatprep.subr.bf16.mxu0 %v4239_v34 }
 0x74c   :  { %1621 = vadd.xlane.f32.xlu0 %v1620_v39  ;;  %v4243_v39 = vpack.c.bf16 %v1778_v38, %v1777_v35  ;;  %4252 = vmatprep.subr.bf16.mxu1 %v4251_v56 }
 0x74e   :  { %4242 = vmatpush3.bf16.msra.mxu0 %v4239_v34  ;;  %v4255_v34 = vpack.c.bf16 %v1908_v33, %v1907_v32 }
 0x74f   :  { %4244 = vmatprep.subr.bf16.mxu0 %v4243_v39 }
 0x752   :  { %4246 = vmatpush3.bf16.msra.mxu0 %v4243_v39 }
 0x7d8   :  { %v1625_v40 = vpop.xlane.xlu1 %1624 }
 0x7d9   :  { %v1627_v42 = vmul.f32 0.03125, %v1625_v40  ;;  %v1622_v44 = vpop.xlane.xlu0 %1621  ;;  %v1779_v40 = vld [vmem:[#allocation2 + $0xd0] sm:$0xff] }
 0x7da   :  { %v1626_v45 = vmul.f32 0.03125, %v1622_v44 }
 0x7db   :  { %v1629_v46 = vsub.f32 %v4706_v36, %v1627_v42  ;;  %v1780_v42 = vld [vmem:[#allocation2 + $0xd8] sm:$0xff] }
 0x7dc   :  { %v1628_v1 = vsub.f32 %v4709_v37, %v1626_v45  ;;  %v4247_v44 = vpack.c.bf16 %v1780_v42, %v1779_v40  ;;  %v1664_v45 = vsub.s32 6, %v4494_v26 }
 0x7dd   :  { %v1631_v48 = vmul.f32 %v1629_v46, %v1629_v46 }
 0x7de   :  { %v1630_v47 = vmul.f32 %v1628_v1, %v1628_v1  ;;  %4248 = vmatprep.subr.bf16.mxu0 %v4247_v44 }
 0x7df   :  { %v1635_v49 = vsel %vm31_vm0, %v1631_v48, 0.0  ;;  %4250 = vmatpush3.bf16.msra.mxu0 %v4247_v44 }
 0x7e0   :  { %v1632_v0 = vsel %vm31_vm0, %v1630_v47, 0.0  ;;  %4088 = vmatprep.subr.mxu0 %v4434_v43 }
 0x7e1   :  { %1633 = vadd.xlane.f32.xlu0 %v1632_v0 }
 0x7e5   :  { %1636 = vadd.xlane.f32.xlu0 %v1635_v49 }
 0x86e   :  { %v1634_v61 = vpop.xlane.xlu0 %1633 }
 0x86f   :  { %v1638_v62 = vmul.f32 0.03125, %v1634_v61 }
 0x871   :  { %v1640_v63 = vadd.f32 1e-05, %v1638_v62 }
 0x872   :  { %v1637_v2 = vpop.xlane.xlu0 %1636 }
 0x873   :  { %4355 = vrsqrt.f32 %v1640_v63  ;;  %v1639_v3 = vmul.f32 0.03125, %v1637_v2 }
 0x875   :  { %v1641_v4 = vadd.f32 1e-05, %v1639_v3 }
 0x877   :  { %4357 = vrsqrt.f32 %v1641_v4 }
 0x87d   :  { %v4356_v8 = vpop.eup %4355 }
 0x87e   :  { %v1644_v9 = vmul.f32 %v4356_v8, %v1628_v1 }
 0x880   :  { %v1650_v11 = vmul.f32 %v1649_v7, %v1644_v9  ;;  %v1858_v9 = vsub.s32 7, %v4494_v26 }
 0x881   :  { %v4358_v12 = vpop.eup %4357 }
 0x882   :  { %v1645_v13 = vmul.f32 %v4358_v12, %v1629_v46  ;;  %v1656_v14 = vadd.f32 %v1655_v10, %v1650_v11  ;;  %v1665_v46 = vrot.slane %v4500_v29, %v1664_v45 }
 0x884   :  { %v1651_v15 = vmul.f32 %v1649_v7, %v1645_v13  ;;  %4009 = vmatprep.mubr.msk.f32.mxu1 %vm31_vm0, %v1656_v14 }
 0x886   :  { %v1657_v16 = vadd.f32 %v1655_v10, %v1651_v15  ;;  %v1859_v10 = vrot.slane %v4500_v29, %v1858_v9 }
 0x888   :  { %4010 = vmatmul.mubr.msk.f32.vlgmr.msra.gmra.mrb[22].mxu1 %vm31_vm0, %v1657_v16 }
 0x889   :  { %4254 = vmatpush3.bf16.msra.mxu1 %v4251_v56 }
 0x88a   :  { %4256 = vmatprep.subr.bf16.mxu1 %v4255_v34 }
 0x88d   :  { %4258 = vmatpush3.bf16.msra.mxu1 %v4255_v34 }
 0x88e   :  { %4058 = vmatprep.subr.mxu1 %v4434_v43 }
 0x95b   :  { %v4011_v1 = vpop.f32.mrb[22].mxu1 }
 0x95c   :  { %v1744_v47 = vadd.f32 %v4011_v1, %v1665_v46  ;;  %v1738_v0 = vpop.f32.mrb[23].mxu1 }
 0x95d   :  { %v1739_v48 = vadd.f32 %v1738_v0, %v1665_v46  ;;  %v4758_v46 = vld [vmem:[%s4996_s2 + $0x8] sm:$0xff] }
 0x95e   :  { %v1750_v49 = vmul.f32 0.044715, %v1744_v47  ;;  %v1748_v4 = vmul.f32 0.5, %v1744_v47  ;;  %v1895_v1 = vrot.slane %v4758_v46, %v61_v28  ;;  %v1912_v28 = vrot.slane %v4758_v46, %v77_v41 }
 0x95f   :  { %v1749_v50 = vmul.f32 0.044715, %v1739_v48  ;;  %v1747_v2 = vmul.f32 0.5, %v1739_v48 }
 0x960   :  { %v1752_v51 = vmul.f32 %v1750_v49, %v1744_v47 }
 0x961   :  { %v1751_v52 = vmul.f32 %v1749_v50, %v1739_v48 }
 0x962   :  { %v1754_v54 = vmul.f32 %v1752_v51, %v1744_v47 }
 0x963   :  { %v1753_v55 = vmul.f32 %v1751_v52, %v1739_v48 }
 0x964   :  { %v1756_v57 = vadd.f32 %v1754_v54, %v1744_v47 }
 0x965   :  { %v1755_v58 = vadd.f32 %v1753_v55, %v1739_v48  ;;  %v1901_v48 = vrot.slane %v4758_v46, %v67_v30 }
 0x966   :  { %v1758_v59 = vmul.f32 0.7978846, %v1756_v57 }
 0x967   :  { %v1757_v60 = vmul.f32 0.7978846, %v1755_v58 }
 0x968   :  { %4359 = vtanh.f32 %v1758_v59 }
 0x969   :  { %4361 = vtanh.f32 %v1757_v60 }
 0x972   :  { %v4360_v61 = vpop.eup %4359 }
 0x973   :  { %v4362_v62 = vpop.eup %4361  ;;  %v1762_v63 = vadd.f32 1.0, %v4360_v61 }
 0x974   :  { %v1761_v3 = vadd.f32 1.0, %v4362_v62 }
 0x975   :  { %v1764_v8 = vmul.f32 %v1762_v63, %v1748_v4 }
 0x976   :  { %v1763_v7 = vmul.f32 %v1761_v3, %v1747_v2 }
 0x978   :  { %4044 = vmatprep.mubr.f32.mxu0 %v1763_v7 }
 0x979   :  { %4045 = vmatmul.mubr.f32.vlgmr.msra.gmra.mrb[14].mxu0 %v1764_v8 }
 0x97a   :  { %4090 = vmatprep.mubr.msk.f32.mxu0 %vm4435_vm1, %v4434_v43 }
 0xa4c   :  { %v4046_v11 = vpop.f32.mrb[14].mxu0 }
 0xa4d   :  { %v1861_v12 = vadd.f32 %v4046_v11, %v1859_v10  ;;  %v1847_v13 = vpop.f32.mrb[15].mxu0 }
 0xa4e   :  { %v1860_v14 = vadd.f32 %v1859_v10, %v1847_v13 }
 0xa4f   :  { %v4741_v15 = vadd.f32 %v1861_v12, %v4706_v36 }
 0xa50   :  { %v4744_v16 = vadd.f32 %v1860_v14, %v4709_v37 }
 0xa51   :  { %v1869_v17 = vsel %vm31_vm0, %v4741_v15, 0.0 }
 0xa52   :  { %1870 = vadd.xlane.f32.xlu1 %v1869_v17  ;;  %v1866_v18 = vsel %vm31_vm0, %v4744_v16, 0.0 }
 0xa53   :  { %1867 = vadd.xlane.f32.xlu0 %v1866_v18 }
 0xadf   :  { %v1871_v19 = vpop.xlane.xlu1 %1870 }
 0xae0   :  { %v1873_v29 = vmul.f32 0.03125, %v1871_v19  ;;  %v1868_v20 = vpop.xlane.xlu0 %1867 }
 0xae1   :  { %v1872_v21 = vmul.f32 0.03125, %v1868_v20 }
 0xae2   :  { %v1875_v22 = vsub.f32 %v4741_v15, %v1873_v29 }
 0xae3   :  { %v1874_v36 = vsub.f32 %v4744_v16, %v1872_v21 }
 0xae4   :  { %v1877_v23 = vmul.f32 %v1875_v22, %v1875_v22 }
 0xae5   :  { %v1876_v24 = vmul.f32 %v1874_v36, %v1874_v36 }
 0xae6   :  { %v1881_v37 = vsel %vm31_vm0, %v1877_v23, 0.0 }
 0xae7   :  { %1882 = vadd.xlane.f32.xlu1 %v1881_v37  ;;  %v1878_v25 = vsel %vm31_vm0, %v1876_v24, 0.0 }
 0xae8   :  { %1879 = vadd.xlane.f32.xlu0 %v1878_v25 }
 0xb74   :  { %v1883_v35 = vpop.xlane.xlu1 %1882 }
 0xb75   :  { %v1885_v38 = vmul.f32 0.03125, %v1883_v35  ;;  %v1880_v39 = vpop.xlane.xlu0 %1879 }
 0xb76   :  { %v1884_v40 = vmul.f32 0.03125, %v1880_v39 }
 0xb77   :  { %v1887_v42 = vadd.f32 1e-05, %v1885_v38 }
 0xb78   :  { %v1886_v44 = vadd.f32 1e-05, %v1884_v40 }
 0xb79   :  { %4363 = vrsqrt.f32 %v1887_v42 }
 0xb7a   :  { %4365 = vrsqrt.f32 %v1886_v44 }
 0xb83   :  { %v4364_v47 = vpop.eup %4363 }
 0xb84   :  { %v4366_v0 = vpop.eup %4365  ;;  %v1891_v49 = vmul.f32 %v4364_v47, %v1875_v22 }
 0xb85   :  { %v1890_v50 = vmul.f32 %v4366_v0, %v1874_v36 }
 0xb86   :  { %v1897_v51 = vmul.f32 %v1895_v1, %v1891_v49 }
 0xb87   :  { %v1896_v52 = vmul.f32 %v1895_v1, %v1890_v50 }
 0xb88   :  { %v1903_v54 = vadd.f32 %v1901_v48, %v1897_v51 }
 0xb89   :  { %v1902_v55 = vadd.f32 %v1901_v48, %v1896_v52 }
 0xb8b   :  { %4055 = vmatprep.mubr.msk.f32.mxu1 %vm31_vm0, %v1902_v55 }
 0xb8c   :  { %4056 = vmatmul.mubr.msk.f32.vlgmr.msra.gmra.mrb[24].mxu1 %vm31_vm0, %v1903_v54 }
 0xb8d   :  { %4060 = vmatprep.mubr.msk.f32.mxu1 %vm4435_vm1, %v4434_v43 }
 0xc5f   :  { %v4057_v57 = vpop.f32.mrb[24].mxu1 }
 0xc60   :  { %v4773_v58 = vadd.f32 %v4057_v57, %v1912_v28  ;;  %v1985_v30 = vpop.f32.mrb[25].mxu1 }
 0xc61   :  { %v4775_v59 = vadd.f32 %v1985_v30, %v1912_v28 }
 0xc62   :  { %2014 = vrot.lane.b32.xlu1 %v4773_v58, %s4436_s30  ;;  %v1995_v60 = vmul.f32 0.35355338, %v4773_v58 }
 0xc63   :  { %2012 = vrot.lane.b32.xlu0 %v4775_v59, %s4436_s30  ;;  %v1994_v41 = vmul.f32 0.35355338, %v4775_v59 }
 0xc66   :  { %2016 = vrot.lane.b32.xlu1 %v4775_v59, %s4437_s4 }
 0xc67   :  { %2020 = vrot.lane.b32.xlu0 %v4775_v59, %s4438_s5 }
 0xc6a   :  { %2018 = vrot.lane.b32.xlu1 %v4773_v58, %s4437_s4 }
 0xc6b   :  { %2024 = vrot.lane.b32.xlu0 %v4775_v59, %s4439_s6 }
 0xc6e   :  { %2022 = vrot.lane.b32.xlu1 %v4773_v58, %s4438_s5 }
 0xc72   :  { %2100 = vrot.lane.b32.xlu1 %v4773_v58, %s4439_s6 }
 0xc76   :  { %1998 = vrot.lane.b32.xlu1 %v1994_v41, %s4436_s30 }
 0xc7a   :  { %2000 = vrot.lane.b32.xlu1 %v1995_v60, %s4436_s30 }
 0xc7e   :  { %2002 = vrot.lane.b32.xlu1 %v1994_v41, %s4437_s4 }
 0xc82   :  { %2004 = vrot.lane.b32.xlu1 %v1995_v60, %s4437_s4 }
 0xcd4   :  { %v4799_v61 = vpop.permute.xlu1 %2014 }
 0xcd5   :  { %v4801_v62 = vpop.permute.xlu0 %2012 }
 0xcd6   :  { %2176 = vrot.lane.b32.xlu0 %v4801_v62, %s4439_s6 }
 0xcd8   :  { %v4805_v63 = vpop.permute.xlu1 %2016 }
 0xcd9   :  { %v4807_v2 = vpop.permute.xlu0 %2020 }
 0xcda   :  { %2252 = vrot.lane.b32.xlu0 %v4799_v61, %s4439_s6 }
 0xcdc   :  { %v4811_v3 = vpop.permute.xlu1 %2018 }
 0xcdd   :  { %v2025_v4 = vpop.permute.xlu0 %2024 }
 0xcde   :  { %2328 = vrot.lane.b32.xlu0 %v4805_v63, %s4439_s6  ;;  %4059 = vmatpush3.xpose.msk.msra.mxu1 %vm192_vm2, %v2025_v4 }
 0xcdf   :  { %4063 = vmatprep.subr.mxu1 %v4434_v43 }
 0xce0   :  { %v4817_v7 = vpop.permute.xlu1 %2022 }
 0xce1   :  { %2556 = vrot.lane.b32.xlu1 %v4817_v7, %s4439_s6  ;;  %4061 = vmatmul.mubr.msk.f32.vlgmr.msra.gmra.mrb[26].mxu1 %vm192_vm2, %v1994_v41 }
 0xce2   :  { %2404 = vrot.lane.b32.xlu0 %v4811_v3, %s4439_s6  ;;  %4065 = vmatprep.mubr.msk.f32.mxu1 %vm4435_vm1, %v4434_v43 }
 0xce4   :  { %v2101_v8 = vpop.permute.xlu1 %2100 }
 0xce5   :  { %2008 = vrot.lane.b32.xlu1 %v1995_v60, %s4438_s5  ;;  %4064 = vmatpush3.xpose.msk.msra.mxu1 %vm192_vm2, %v2101_v8 }
 0xce6   :  { %2480 = vrot.lane.b32.xlu0 %v4807_v2, %s4439_s6  ;;  %4068 = vmatprep.subr.mxu1 %v4434_v43 }
 0xce8   :  { %4066 = vmatmul.mubr.msk.f32.vlgmr.msra.gmra.mrb[28].mxu1 %vm192_vm2, %v1995_v60  ;;  %v1999_v10 = vpop.permute.xlu1 %1998 }
 0xce9   :  { %4070 = vmatprep.mubr.msk.f32.mxu1 %vm4435_vm1, %v4434_v43 }
 0xcea   :  { %2006 = vrot.lane.b32.xlu0 %v1994_v41, %s4438_s5 }
 0xcec   :  { %v2001_v11 = vpop.permute.xlu1 %2000 }
 0xcf0   :  { %v2003_v13 = vpop.permute.xlu1 %2002 }
 0xcf4   :  { %v2005_v18 = vpop.permute.xlu1 %2004 }
 0xd48   :  { %v2177_v12 = vpop.permute.xlu0 %2176 }
 0xd49   :  { %4069 = vmatpush3.xpose.msk.msra.mxu1 %vm192_vm2, %v2177_v12 }
 0xd4a   :  { %4073 = vmatprep.subr.mxu1 %v4434_v43 }
 0xd4c   :  { %v2253_v14 = vpop.permute.xlu0 %2252  ;;  %4071 = vmatmul.mubr.msk.f32.vlgmr.msra.gmra.mrb[30].mxu1 %vm192_vm2, %v1999_v10 }
 0xd4d   :  { %4074 = vmatpush3.xpose.msk.msra.mxu1 %vm192_vm2, %v2253_v14  ;;  %4075 = vmatprep.mubr.msk.f32.mxu1 %vm4435_vm1, %v4434_v43 }
 0xd4e   :  { %4078 = vmatprep.subr.mxu1 %v4434_v43 }
 0xd50   :  { %v2329_v17 = vpop.permute.xlu0 %2328  ;;  %4076 = vmatmul.mubr.msk.f32.vlgmr.msra.gmra.mrb[32].mxu1 %vm192_vm2, %v2001_v11 }
 0xd51   :  { %4079 = vmatpush3.xpose.msk.msra.mxu1 %vm192_vm2, %v2329_v17  ;;  %4080 = vmatprep.mubr.msk.f32.mxu1 %vm4435_vm1, %v4434_v43 }
 0xd52   :  { %4083 = vmatprep.subr.mxu1 %v4434_v43 }
 0xd53   :  { %v2557_v29 = vpop.permute.xlu1 %2556 }
 0xd54   :  { %v2405_v19 = vpop.permute.xlu0 %2404  ;;  %4081 = vmatmul.mubr.msk.f32.vlgmr.msra.gmra.mrb[34].mxu1 %vm192_vm2, %v2003_v13 }
 0xd55   :  { %4084 = vmatpush3.xpose.msk.msra.mxu1 %vm192_vm2, %v2405_v19  ;;  %4085 = vmatprep.mubr.msk.f32.mxu1 %vm4435_vm1, %v4434_v43 }
 0xd56   :  { %4093 = vmatprep.subr.mxu1 %v4434_v43 }
 0xd57   :  { %v2009_v21 = vpop.permute.xlu1 %2008 }
 0xd58   :  { %v2481_v20 = vpop.permute.xlu0 %2480  ;;  %4086 = vmatmul.mubr.msk.f32.vlgmr.msra.gmra.mrb[36].mxu1 %vm192_vm2, %v2005_v18 }
 0xd59   :  { %4089 = vmatpush3.xpose.msk.msra.mxu0 %vm192_vm2, %v2481_v20  ;;  %4094 = vmatpush3.xpose.msk.msra.mxu1 %vm192_vm2, %v2557_v29 }
 0xd5a   :  { %4095 = vmatprep.mubr.msk.f32.mxu1 %vm4435_vm1, %v4434_v43  ;;  %4103 = vmatprep.subr.mxu1 %v4434_v43 }
 0xd5b   :  { %4098 = vmatprep.subr.mxu0 %v4434_v43 }
 0xd5c   :  { %v2007_v22 = vpop.permute.xlu0 %2006  ;;  %4096 = vmatmul.mubr.msk.f32.vlgmr.msra.gmra.mrb[38].mxu1 %vm192_vm2, %v2009_v21 }
 0xd5d   :  { %4091 = vmatmul.mubr.msk.f32.vlgmr.msra.gmra.mrb[16].mxu0 %vm192_vm2, %v2007_v22  ;;  %4105 = vmatprep.mubr.msk.f32.mxu1 %vm4435_vm1, %v4434_v43 }
 0xd5e   :  { %4100 = vmatprep.mubr.msk.f32.mxu0 %vm4435_vm1, %v4434_v43 }
 0xdb4   :  { %v2096_v36 = vpop.f32.mrb[26].mxu1 }
 0xdb5   :  { %v4062_v23 = vpop.f32.mrb[27].mxu1  ;;  %v2632_v24 = vsel %vm192_vm2, %v2096_v36, -inf }
 0xdb6   :  { %2633 = vmax.xlane.f32.xlu0 %v2632_v24 }
 0xdbb   :  { %v2172_v37 = vpop.f32.mrb[28].mxu1 }
 0xdbc   :  { %v4067_v25 = vpop.f32.mrb[29].mxu1  ;;  %v2635_v27 = vsel %vm192_vm2, %v2172_v37, -inf }
 0xdbd   :  { %2636 = vmax.xlane.f32.xlu1 %v2635_v27 }
 0xe1f   :  { %v2248_v31 = vpop.f32.mrb[30].mxu1 }
 0xe20   :  { %v4072_v56 = vpop.f32.mrb[31].mxu1  ;;  %v2638_v32 = vsel %vm192_vm2, %v2248_v31, -inf }
 0xe21   :  { %2639 = vmax.xlane.f32.xlu0 %v2638_v32 }
 0xe23   :  { %v2324_v33 = vpop.f32.mrb[32].mxu1 }
 0xe24   :  { %v4077_v34 = vpop.f32.mrb[33].mxu1  ;;  %v2641_v35 = vsel %vm192_vm2, %v2324_v33, -inf }
 0xe25   :  { %2642 = vmax.xlane.f32.xlu0 %v2641_v35 }
 0xe27   :  { %v2400_v38 = vpop.f32.mrb[34].mxu1 }
 0xe28   :  { %v4082_v39 = vpop.f32.mrb[35].mxu1  ;;  %v2644_v40 = vsel %vm192_vm2, %v2400_v38, -inf }
 0xe29   :  { %2645 = vmax.xlane.f32.xlu0 %v2644_v40 }
 0xe2b   :  { %v2476_v42 = vpop.f32.mrb[36].mxu1 }
 0xe2c   :  { %v4087_v44 = vpop.f32.mrb[37].mxu1  ;;  %v2647_v1 = vsel %vm192_vm2, %v2476_v42, -inf }
 0xe2d   :  { %2648 = vmax.xlane.f32.xlu1 %v2647_v1 }
 0xe2f   :  { %v2628_v47 = vpop.f32.mrb[38].mxu1 }
 0xe30   :  { %v2552_v0 = vpop.f32.mrb[16].mxu0  ;;  %v4097_v48 = vpop.f32.mrb[39].mxu1  ;;  %v2653_v49 = vsel %vm192_vm2, %v2628_v47, -inf }
 0xe31   :  { %v4092_v50 = vpop.f32.mrb[17].mxu0  ;;  %2654 = vmax.xlane.f32.xlu1 %v2653_v49  ;;  %v2650_v51 = vsel %vm192_vm2, %v2552_v0, -inf }
 0xe32   :  { %2651 = vmax.xlane.f32.xlu0 %v2650_v51 }
 0xe42   :  { %2796 = vrot.lane.b32.xlu1 %v4773_v58, %s4440_s7 }
 0xe43   :  { %v2634_v52 = vpop.xlane.xlu0 %2633 }
 0xe44   :  { %v2656_v54 = vsub.f32 %v2096_v36, %v2634_v52 }
 0xe46   :  { %2872 = vrot.lane.b32.xlu1 %v4801_v62, %s4440_s7  ;;  %v2664_v55 = vmul.f32 1.442695, %v2656_v54 }
 0xe48   :  { %2720 = vrot.lane.b32.xlu0 %v4775_v59, %s4440_s7  ;;  %4367 = vpow2.f32 %v2664_v55 }
 0xe4a   :  { %2948 = vrot.lane.b32.xlu1 %v4799_v61, %s4440_s7  ;;  %v2637_v28 = vpop.xlane.xlu1 %2636 }
 0xe4b   :  { %v2657_v57 = vsub.f32 %v2172_v37, %v2637_v28 }
 0xe4c   :  { %3024 = vrot.lane.b32.xlu0 %v4805_v63, %s4440_s7 }
 0xe4d   :  { %v2666_v58 = vmul.f32 1.442695, %v2657_v57 }
 0xe4e   :  { %3100 = vrot.lane.b32.xlu1 %v4811_v3, %s4440_s7 }
 0xe4f   :  { %4369 = vpow2.f32 %v2666_v58 }
 0xe52   :  { %v4885_v30 = vpop.eup %4367 }
 0xe53   :  { %v2680_v59 = vsel %vm192_vm2, %v4885_v30, 0.0 }
 0xe59   :  { %v4889_v41 = vpop.eup %4369 }
 0xe5a   :  { %v2683_v60 = vsel %vm192_vm2, %v4889_v41, 0.0 }
 0xe6b   :  { %2681 = vadd.xlane.f32.xlu0 %v2680_v59 }
 0xe72   :  { %2684 = vadd.xlane.f32.xlu1 %v2683_v60 }
 0xeae   :  { %v2640_v61 = vpop.xlane.xlu0 %2639 }
 0xeaf   :  { %v2658_v62 = vsub.f32 %v2248_v31, %v2640_v61 }
 0xeb1   :  { %v2668_v63 = vmul.f32 1.442695, %v2658_v62 }
 0xeb2   :  { %v2643_v3 = vpop.xlane.xlu0 %2642 }
 0xeb3   :  { %4371 = vpow2.f32 %v2668_v63  ;;  %v2659_v4 = vsub.f32 %v2324_v33, %v2643_v3 }
 0xeb5   :  { %v2670_v8 = vmul.f32 1.442695, %v2659_v4 }
 0xeb6   :  { %v2646_v11 = vpop.xlane.xlu0 %2645 }
 0xeb7   :  { %4373 = vpow2.f32 %v2670_v8  ;;  %v2660_v17 = vsub.f32 %v2400_v38, %v2646_v11 }
 0xeb9   :  { %v2672_v23 = vmul.f32 1.442695, %v2660_v17 }
 0xeba   :  { %v2649_v10 = vpop.xlane.xlu1 %2648 }
 0xebb   :  { %v2661_v12 = vsub.f32 %v2476_v42, %v2649_v10 }
 0xebd   :  { %v4893_v13 = vpop.eup %4371  ;;  %v2674_v14 = vmul.f32 1.442695, %v2661_v12 }
 0xebe   :  { %v2655_v18 = vpop.xlane.xlu1 %2654  ;;  %v2686_v19 = vsel %vm192_vm2, %v4893_v13, 0.0 }
 0xebf   :  { %4375 = vpow2.f32 %v2674_v14  ;;  %v2663_v29 = vsub.f32 %v2628_v47, %v2655_v18  ;;  %2687 = vadd.xlane.f32.xlu0 %v2686_v19  ;;  %v2652_v20 = vpop.xlane.xlu0 %2651 }
 0xec0   :  { %v2662_v21 = vsub.f32 %v2552_v0, %v2652_v20  ;;  %v3358_v20 = vld [vmem:[#allocation2 + $0x100] sm:$0xff] }
 0xec1   :  { %v4374_v22 = vpop.eup %4373  ;;  %v2678_v36 = vmul.f32 1.442695, %v2663_v29 }
 0xec2   :  { %v2676_v24 = vmul.f32 1.442695, %v2662_v21  ;;  %v2797_v37 = vpop.permute.xlu1 %2796  ;;  %v2689_v25 = vsel %vm192_vm2, %v4374_v22, 0.0  ;;  %v3359_v21 = vld [vmem:[#allocation2 + $0x108] sm:$0xff] }
 0xec3   :  { %4377 = vpow2.f32 %v2678_v36  ;;  %v2721_v27 = vpop.permute.xlu0 %2720  ;;  %2690 = vadd.xlane.f32.xlu1 %v2689_v25  ;;  %4104 = vmatpush3.msra.mxu1 %v2797_v37  ;;  %v4259_v36 = vpack.c.bf16 %v3359_v21, %v3358_v20 }
 0xec4   :  { %4379 = vpow2.f32 %v2676_v24  ;;  %4099 = vmatpush3.msra.mxu0 %v2721_v27  ;;  %4113 = vmatprep.subr.mxu1 %v4434_v43 }
 0xec5   :  { %4108 = vmatprep.subr.mxu0 %v4434_v43  ;;  %4381 = vpow2.f32 %v2672_v23  ;;  %v3361_v23 = vld [vmem:[#allocation2 + $0x118] sm:$0xff] }
 0xec6   :  { %v2873_v40 = vpop.permute.xlu1 %2872 }
 0xec7   :  { %v3025_v42 = vpop.permute.xlu0 %3024 }
 0xec9   :  { %v4376_v31 = vpop.eup %4375 }
 0xeca   :  { %v2695_v56 = vsel %vm192_vm2, %v4376_v31, 0.0  ;;  %v2949_v44 = vpop.permute.xlu1 %2948 }
 0xecb   :  { %2696 = vadd.xlane.f32.xlu1 %v2695_v56 }
 0xecd   :  { %v4378_v32 = vpop.eup %4377 }
 0xece   :  { %v4901_v33 = vpop.eup %4379  ;;  %v2701_v34 = vsel %vm192_vm2, %v4378_v32, 0.0  ;;  %v3101_v47 = vpop.permute.xlu1 %3100 }
 0xecf   :  { %2702 = vadd.xlane.f32.xlu1 %v2701_v34  ;;  %v2698_v35 = vsel %vm192_vm2, %v4901_v33, 0.0  ;;  %v4382_v38 = vpop.eup %4381 }
 0xed0   :  { %2699 = vadd.xlane.f32.xlu0 %v2698_v35  ;;  %v2692_v39 = vsel %vm192_vm2, %v4382_v38, 0.0 }
 0xed4   :  { %2693 = vadd.xlane.f32.xlu0 %v2692_v39 }
 0xee0   :  { %3252 = vrot.lane.b32.xlu1 %v4817_v7, %s4440_s7 }
 0xeea   :  { %3176 = vrot.lane.b32.xlu0 %v4807_v2, %s4440_s7 }
 0xef8   :  { %v2682_v1 = vpop.xlane.xlu0 %2681 }
 0xef9   :  { %4383 = vrcp.f32 %v2682_v1 }
 0xeff   :  { %v2685_v0 = vpop.xlane.xlu1 %2684 }
 0xf00   :  { %4385 = vrcp.f32 %v2685_v0 }
 0xf03   :  { %v4384_v48 = vpop.eup %4383 }
 0xf04   :  { %v2712_v49 = vmul.f32 %v4384_v48, %v4885_v30 }
 0xf06   :  { %4101 = vmatmul.mubr.msk.f32.vlgmr.msra.gmra.mrb[18].mxu0 %vm192_vm2, %v2712_v49 }
 0xf07   :  { %4109 = vmatpush3.msra.mxu0 %v2873_v40  ;;  %4110 = vmatprep.mubr.msk.f32.mxu0 %vm4435_vm1, %v4434_v43 }
 0xf08   :  { %4118 = vmatprep.subr.mxu0 %v4434_v43 }
 0xf0a   :  { %v4386_v2 = vpop.eup %4385 }
 0xf0b   :  { %v2713_v7 = vmul.f32 %v4386_v2, %v4889_v41 }
 0xf0d   :  { %4106 = vmatmul.mubr.msk.f32.vlgmr.msra.gmra.mrb[40].mxu1 %vm192_vm2, %v2713_v7  ;;  %v3446_v7 = vrot.slane %v4758_v46, %v1614_v53 }
 0xf0e   :  { %4114 = vmatpush3.msra.mxu1 %v2949_v44  ;;  %4115 = vmatprep.mubr.msk.f32.mxu1 %vm4435_vm1, %v4434_v43 }
 0xf0f   :  { %4123 = vmatprep.subr.mxu1 %v4434_v43 }
 0xf4c   :  { %v2688_v50 = vpop.xlane.xlu0 %2687 }
 0xf4d   :  { %4387 = vrcp.f32 %v2688_v50 }
 0xf50   :  { %v2691_v51 = vpop.xlane.xlu1 %2690 }
 0xf51   :  { %4389 = vrcp.f32 %v2691_v51 }
 0xf57   :  { %v4388_v52 = vpop.eup %4387 }
 0xf58   :  { %v2714_v54 = vmul.f32 %v4388_v52, %v4893_v13  ;;  %v2697_v55 = vpop.xlane.xlu1 %2696 }
 0xf59   :  { %4391 = vrcp.f32 %v2697_v55 }
 0xf5a   :  { %4111 = vmatmul.mubr.msk.f32.vlgmr.msra.gmra.mrb[20].mxu0 %vm192_vm2, %v2714_v54 }
 0xf5b   :  { %v4390_v28 = vpop.eup %4389  ;;  %4119 = vmatpush3.msra.mxu0 %v3025_v42  ;;  %4120 = vmatprep.mubr.msk.f32.mxu0 %vm4435_vm1, %v4434_v43 }
 0xf5c   :  { %v2715_v57 = vmul.f32 %v4390_v28, %v4374_v22  ;;  %v2703_v58 = vpop.xlane.xlu1 %2702  ;;  %4128 = vmatprep.subr.mxu0 %v4434_v43 }
 0xf5d   :  { %4393 = vrcp.f32 %v2703_v58  ;;  %v2700_v30 = vpop.xlane.xlu0 %2699 }
 0xf5e   :  { %4116 = vmatmul.mubr.msk.f32.vlgmr.msra.gmra.mrb[42].mxu1 %vm192_vm2, %v2715_v57 }
 0xf5f   :  { %4124 = vmatpush3.msra.mxu1 %v3101_v47  ;;  %4125 = vmatprep.mubr.msk.f32.mxu1 %vm4435_vm1, %v4434_v43 }
 0xf60   :  { %4133 = vmatprep.subr.mxu1 %v4434_v43  ;;  %v3253_v61 = vpop.permute.xlu1 %3252 }
 0xf61   :  { %v2694_v59 = vpop.xlane.xlu0 %2693 }
 0xf62   :  { %4395 = vrcp.f32 %v2694_v59 }
 0xf63   :  { %v4392_v41 = vpop.eup %4391  ;;  %4397 = vrcp.f32 %v2700_v30 }
 0xf64   :  { %v2717_v60 = vmul.f32 %v4392_v41, %v4376_v31 }
 0xf65   :  { %v3177_v10 = vpop.permute.xlu0 %3176 }
 0xf66   :  { %4126 = vmatmul.mubr.msk.f32.vlgmr.msra.gmra.mrb[44].mxu1 %vm192_vm2, %v2717_v60 }
 0xf67   :  { %v4394_v62 = vpop.eup %4393  ;;  %4134 = vmatpush3.msra.mxu1 %v3253_v61  ;;  %4135 = vmatprep.mubr.msk.f32.mxu1 %vm4435_vm1, %v4434_v43 }
 0xf68   :  { %v2719_v63 = vmul.f32 %v4394_v62, %v4378_v32 }
 0xf6a   :  { %4136 = vmatmul.mubr.msk.f32.vlgmr.msra.gmra.mrb[46].mxu1 %vm192_vm2, %v2719_v63 }
 0xf6c   :  { %v4396_v3 = vpop.eup %4395 }
 0xf6d   :  { %v2716_v4 = vmul.f32 %v4396_v3, %v4382_v38  ;;  %v4398_v8 = vpop.eup %4397  ;;  %v3489_v3 = vld [vmem:[#allocation2 + $0x120] sm:$0xff] }
 0xf6e   :  { %v2718_v11 = vmul.f32 %v4398_v8, %v4901_v33 }
 0xf6f   :  { %4121 = vmatmul.mubr.msk.f32.vlgmr.msra.gmra.mrb[22].mxu0 %vm192_vm2, %v2716_v4  ;;  %v3490_v4 = vld [vmem:[#allocation2 + $0x128] sm:$0xff] }
 0xf70   :  { %4129 = vmatpush3.msra.mxu0 %v3177_v10  ;;  %4130 = vmatprep.mubr.msk.f32.mxu0 %vm4435_vm1, %v4434_v43  ;;  %v3360_v43 = vld [vmem:[#allocation2 + $0x110] sm:$0xff]  ;;  %v4267_v8 = vpack.c.bf16 %v3490_v4, %v3489_v3 }
 0xf71   :  { %4260 = vmatprep.subr.bf16.mxu0 %v4259_v36  ;;  %v4263_v24 = vpack.c.bf16 %v3361_v23, %v3360_v43  ;;  %v3491_v10 = vld [vmem:[#allocation2 + $0x130] sm:$0xff] }
 0xf72   :  { %4268 = vmatprep.subr.bf16.mxu1 %v4267_v8 }
 0xf73   :  { %4131 = vmatmul.mubr.msk.f32.vlgmr.msra.gmra.mrb[24].mxu0 %vm192_vm2, %v2718_v11  ;;  %v3492_v11 = vld [vmem:[#allocation2 + $0x138] sm:$0xff]  ;;  %4270 = vmatpush3.bf16.msra.mxu1 %v4267_v8 }
 0xf74   :  { %4262 = vmatpush3.bf16.msra.mxu0 %v4259_v36  ;;  %v3480_v36 = vrot.slane %v4758_v46, %v1648_v5  ;;  %v3600_v5 = vld [vmem:[#allocation2 + $0x160] sm:$0xff] }
 0xf75   :  { %4264 = vmatprep.subr.bf16.mxu0 %v4263_v24 }
 0xf78   :  { %4266 = vmatpush3.bf16.msra.mxu0 %v4263_v24  ;;  %v3486_v24 = vrot.slane %v4758_v46, %v1654_v6  ;;  %v3602_v6 = vld [vmem:[#allocation2 + $0x170] sm:$0xff] }
 0xfd9   :  { %v2792_v12 = vpop.f32.mrb[18].mxu0 }
 0xfda   :  { %v4102_v13 = vpop.f32.mrb[19].mxu0 }
 0xfdb   :  { %v3596_v13 = vld [vmem:[#allocation2 + $0x140] sm:$0xff] }
 0xfe0   :  { %v2868_v14 = vpop.f32.mrb[40].mxu1 }
 0xfe1   :  { %v4107_v17 = vpop.f32.mrb[41].mxu1 }
0x102d   :  { %v2944_v18 = vpop.f32.mrb[20].mxu0 }
0x102e   :  { %3330 = vrot.lane.b32.xlu0 %v2944_v18, %s4433_s23  ;;  %v4112_v19 = vpop.f32.mrb[21].mxu0 }
0x1031   :  { %v3020_v29 = vpop.f32.mrb[42].mxu1 }
0x1032   :  { %3332 = vrot.lane.b32.xlu1 %v3020_v29, %s4433_s23  ;;  %v4117_v22 = vpop.f32.mrb[43].mxu1 }
0x1039   :  { %v3172_v37 = vpop.f32.mrb[44].mxu1 }
0x103a   :  { %3340 = vrot.lane.b32.xlu1 %v3172_v37, %s4441_s8  ;;  %v4127_v25 = vpop.f32.mrb[45].mxu1 }
0x103d   :  { %v3324_v27 = vpop.f32.mrb[46].mxu1 }
0x103e   :  { %3348 = vrot.lane.b32.xlu1 %v3324_v27, %s4442_s9  ;;  %v4137_v31 = vpop.f32.mrb[47].mxu1 }
0x1042   :  { %v3096_v56 = vpop.f32.mrb[22].mxu0 }
0x1043   :  { %3338 = vrot.lane.b32.xlu0 %v3096_v56, %s4441_s8  ;;  %v4122_v32 = vpop.f32.mrb[23].mxu0 }
0x1046   :  { %v3248_v33 = vpop.f32.mrb[24].mxu0 }
0x1047   :  { %3346 = vrot.lane.b32.xlu0 %v3248_v33, %s4442_s9  ;;  %v4132_v34 = vpop.f32.mrb[25].mxu0  ;;  %v3598_v33 = vld [vmem:[#allocation2 + $0x150] sm:$0xff] }
0x1048   :  { %v3599_v34 = vld [vmem:[#allocation2 + $0x158] sm:$0xff] }
0x10a0   :  { %v3331_v38 = vpop.permute.xlu0 %3330 }
0x10a1   :  { %v3352_v42 = vsel %vm192_vm2, %v2792_v12, %v3331_v38  ;;  %v4271_v12 = vpack.c.bf16 %v3492_v11, %v3491_v10  ;;  %v3601_v38 = vld [vmem:[#allocation2 + $0x168] sm:$0xff] }
0x10a3   :  { %4272 = vmatprep.subr.bf16.mxu1 %v4271_v12 }
0x10a4   :  { %v3333_v35 = vpop.permute.xlu1 %3332  ;;  %4274 = vmatpush3.bf16.msra.mxu1 %v4271_v12 }
0x10a5   :  { %v3353_v1 = vsel %vm192_vm2, %v2868_v14, %v3333_v35  ;;  %v3597_v14 = vld [vmem:[#allocation2 + $0x148] sm:$0xff]  ;;  %v4279_v35 = vpack.c.bf16 %v3599_v34, %v3598_v33 }
0x10a6   :  { %v4275_v17 = vpack.c.bf16 %v3597_v14, %v3596_v13 }
0x10a8   :  { %4276 = vmatprep.subr.bf16.mxu0 %v4275_v17 }
0x10ac   :  { %v3341_v39 = vpop.permute.xlu1 %3340 }
0x10ad   :  { %v3355_v48 = vsel %vm1521_vm3, %v3353_v1, %v3341_v39  ;;  %v4283_v39 = vpack.c.bf16 %v3601_v38, %v3600_v5  ;;  %v3605_v1 = vld [vmem:[#allocation2 + $0x188] sm:$0xff] }
0x10b0   :  { %v3349_v44 = vpop.permute.xlu1 %3348 }
0x10b1   :  { %v3357_v2 = vsel %vm1524_vm4, %v3355_v48, %v3349_v44  ;;  %v3607_v48 = vld [vmem:[#allocation2 + $0x198] sm:$0xff] }
0x10b5   :  { %v3339_v40 = vpop.permute.xlu0 %3338 }
0x10b6   :  { %v3354_v47 = vsel %vm1521_vm3, %v3352_v42, %v3339_v40  ;;  %v3603_v40 = vld [vmem:[#allocation2 + $0x178] sm:$0xff]  ;;  %v3604_v42 = vld [vmem:[#allocation2 + $0x180] sm:$0xff] }
0x10b7   :  { %v4287_v44 = vpack.c.bf16 %v3603_v40, %v3602_v6 }
0x10b9   :  { %v3347_v0 = vpop.permute.xlu0 %3346 }
0x10ba   :  { %v3356_v49 = vsel %vm1524_vm4, %v3354_v47, %v3347_v0  ;;  %v4291_v47 = vpack.c.bf16 %v3605_v1, %v3604_v42  ;;  %v3606_v0 = vld [vmem:[#allocation2 + $0x190] sm:$0xff] }
0x10bb   :  { %4146 = vmatprep.mubr.msk.f32.mxu0 %vm31_vm0, %v3356_v49  ;;  %v4295_v49 = vpack.c.bf16 %v3607_v48, %v3606_v0 }
0x10bc   :  { %4147 = vmatmul.mubr.msk.f32.vlgmr.msra.gmra.mrb[26].mxu0 %vm31_vm0, %v3357_v2  ;;  %v3608_v2 = vld [vmem:[#allocation2 + $0x1a0] sm:$0xff] }
0x10bd   :  { %4278 = vmatpush3.bf16.msra.mxu0 %v4275_v17 }
0x10be   :  { %4280 = vmatprep.subr.bf16.mxu0 %v4279_v35 }
0x10c1   :  { %4282 = vmatpush3.bf16.msra.mxu0 %v4279_v35 }
0x10c2   :  { %4284 = vmatprep.subr.bf16.mxu0 %v4283_v39 }
0x10c5   :  { %4286 = vmatpush3.bf16.msra.mxu0 %v4283_v39 }
0x10c6   :  { %4288 = vmatprep.subr.bf16.mxu0 %v4287_v44 }
0x10c9   :  { %4290 = vmatpush3.bf16.msra.mxu0 %v4287_v44 }
0x10ca   :  { %4292 = vmatprep.subr.bf16.mxu0 %v4291_v47 }
0x10cd   :  { %4294 = vmatpush3.bf16.msra.mxu0 %v4291_v47 }
0x10ce   :  { %4296 = vmatprep.subr.bf16.mxu0 %v4295_v49 }
0x10d1   :  { %4298 = vmatpush3.bf16.msra.mxu0 %v4295_v49 }
0x118f   :  { %v4148_v50 = vpop.f32.mrb[26].mxu0 }
0x1190   :  { %v3448_v51 = vadd.f32 %v4148_v50, %v3446_v7  ;;  %v3434_v52 = vpop.f32.mrb[27].mxu0 }
0x1191   :  { %v3447_v54 = vadd.f32 %v3446_v7, %v3434_v52  ;;  %v3609_v7 = vld [vmem:[#allocation2 + $0x1a8] sm:$0xff]  ;;  %v3611_v52 = vld [vmem:[#allocation2 + $0x1b8] sm:$0xff] }
0x1192   :  { %v4957_v55 = vadd.f32 %v3448_v51, %v4741_v15  ;;  %v4299_v50 = vpack.c.bf16 %v3609_v7, %v3608_v2  ;;  %v3610_v51 = vld [vmem:[#allocation2 + $0x1b0] sm:$0xff] }
0x1193   :  { %v4960_v28 = vadd.f32 %v3447_v54, %v4744_v16  ;;  %v4303_v54 = vpack.c.bf16 %v3611_v52, %v3610_v51 }
0x1194   :  { %v3454_v57 = vsel %vm31_vm0, %v4957_v55, 0.0  ;;  %4300 = vmatprep.subr.bf16.mxu0 %v4299_v50 }
0x1195   :  { %3455 = vadd.xlane.f32.xlu1 %v3454_v57  ;;  %v3451_v58 = vsel %vm31_vm0, %v4960_v28, 0.0  ;;  %4302 = vmatpush3.bf16.msra.mxu0 %v4299_v50  ;;  %v3496_v57 = vrot.slane %v4758_v46, %v1664_v45 }
0x1196   :  { %3452 = vadd.xlane.f32.xlu0 %v3451_v58  ;;  %4304 = vmatprep.subr.bf16.mxu0 %v4303_v54 }
0x1199   :  { %4306 = vmatpush3.bf16.msra.mxu0 %v4303_v54 }
0x1222   :  { %v3456_v30 = vpop.xlane.xlu1 %3455 }
0x1223   :  { %v3458_v53 = vmul.f32 0.03125, %v3456_v30  ;;  %v3453_v59 = vpop.xlane.xlu0 %3452 }
0x1224   :  { %v3457_v41 = vmul.f32 0.03125, %v3453_v59 }
0x1225   :  { %v3460_v60 = vsub.f32 %v4957_v55, %v3458_v53 }
0x1226   :  { %v3459_v15 = vsub.f32 %v4960_v28, %v3457_v41 }
0x1227   :  { %v3462_v62 = vmul.f32 %v3460_v60, %v3460_v60 }
0x1228   :  { %v3461_v61 = vmul.f32 %v3459_v15, %v3459_v15 }
0x1229   :  { %v3466_v63 = vsel %vm31_vm0, %v3462_v62, 0.0 }
0x122a   :  { %v3463_v16 = vsel %vm31_vm0, %v3461_v61, 0.0 }
0x122b   :  { %3464 = vadd.xlane.f32.xlu0 %v3463_v16 }
0x122f   :  { %3467 = vadd.xlane.f32.xlu0 %v3466_v63 }
0x12b8   :  { %v3465_v18 = vpop.xlane.xlu0 %3464 }
0x12b9   :  { %v3469_v19 = vmul.f32 0.03125, %v3465_v18 }
0x12bb   :  { %v3471_v29 = vadd.f32 1e-05, %v3469_v19  ;;  %v3690_v19 = vrot.slane %v4758_v46, %v1858_v9 }
0x12bc   :  { %v3468_v20 = vpop.xlane.xlu0 %3467 }
0x12bd   :  { %4399 = vrsqrt.f32 %v3471_v29  ;;  %v3470_v21 = vmul.f32 0.03125, %v3468_v20 }
0x12bf   :  { %v3472_v22 = vadd.f32 1e-05, %v3470_v21 }
0x12c1   :  { %4401 = vrsqrt.f32 %v3472_v22 }
0x12c7   :  { %v4400_v43 = vpop.eup %4399 }
0x12c8   :  { %v3475_v23 = vmul.f32 %v4400_v43, %v3459_v15 }
0x12ca   :  { %v3481_v37 = vmul.f32 %v3480_v36, %v3475_v23 }
0x12cb   :  { %v4402_v25 = vpop.eup %4401 }
0x12cc   :  { %v3476_v27 = vmul.f32 %v4402_v25, %v3460_v60  ;;  %v3487_v31 = vadd.f32 %v3486_v24, %v3481_v37 }
0x12ce   :  { %v3482_v56 = vmul.f32 %v3480_v36, %v3476_v27  ;;  %4157 = vmatprep.mubr.msk.f32.mxu1 %vm31_vm0, %v3487_v31 }
0x12d0   :  { %v3488_v32 = vadd.f32 %v3486_v24, %v3482_v56 }
0x12d2   :  { %4158 = vmatmul.mubr.msk.f32.vlgmr.msra.gmra.mrb[48].mxu1 %vm31_vm0, %v3488_v32 }
0x13a5   :  { %v4159_v58 = vpop.f32.mrb[48].mxu1 }
0x13a6   :  { %v3575_v30 = vadd.f32 %v4159_v58, %v3496_v57  ;;  %v3569_v53 = vpop.f32.mrb[49].mxu1 }
0x13a7   :  { %v3570_v59 = vadd.f32 %v3569_v53, %v3496_v57 }
0x13a8   :  { %v3581_v41 = vmul.f32 0.044715, %v3575_v30  ;;  %v3579_v14 = vmul.f32 0.5, %v3575_v30 }
0x13a9   :  { %v3580_v60 = vmul.f32 0.044715, %v3570_v59  ;;  %v3578_v45 = vmul.f32 0.5, %v3570_v59 }
0x13aa   :  { %v3583_v15 = vmul.f32 %v3581_v41, %v3575_v30 }
0x13ab   :  { %v3582_v61 = vmul.f32 %v3580_v60, %v3570_v59 }
0x13ac   :  { %v3585_v16 = vmul.f32 %v3583_v15, %v3575_v30 }
0x13ad   :  { %v3584_v62 = vmul.f32 %v3582_v61, %v3570_v59 }
0x13ae   :  { %v3587_v63 = vadd.f32 %v3585_v16, %v3575_v30 }
0x13af   :  { %v3586_v3 = vadd.f32 %v3584_v62, %v3570_v59 }
0x13b0   :  { %v3589_v4 = vmul.f32 0.7978846, %v3587_v63 }
0x13b1   :  { %v3588_v8 = vmul.f32 0.7978846, %v3586_v3 }
0x13b2   :  { %4403 = vtanh.f32 %v3589_v4 }
0x13b3   :  { %4405 = vtanh.f32 %v3588_v8 }
0x13bc   :  { %v4404_v10 = vpop.eup %4403 }
0x13bd   :  { %v4406_v11 = vpop.eup %4405  ;;  %v3593_v12 = vadd.f32 1.0, %v4404_v10 }
0x13be   :  { %v3592_v13 = vadd.f32 1.0, %v4406_v11 }
0x13bf   :  { %v3595_v18 = vmul.f32 %v3593_v12, %v3579_v14 }
0x13c0   :  { %v3594_v17 = vmul.f32 %v3592_v13, %v3578_v45 }
0x13c2   :  { %4192 = vmatprep.mubr.f32.mxu0 %v3594_v17 }
0x13c3   :  { %4193 = vmatmul.mubr.f32.vlgmr.msra.gmra.mrb[28].mxu0 %v3595_v18 }
0x1496   :  { %v4194_v29 = vpop.f32.mrb[28].mxu0 }
0x1497   :  { %v3692_v20 = vadd.f32 %v4194_v29, %v3690_v19  ;;  %v3678_v21 = vpop.f32.mrb[29].mxu0 }
0x1498   :  { %v3691_v22 = vadd.f32 %v3690_v19, %v3678_v21 }
0x1499   :  { %v3694_v36 = vadd.f32 %v3692_v20, %v4957_v55 }
0x149a   :  { %v3693_v43 = vadd.f32 %v3691_v22, %v4960_v28 }
0x149b   :  { %3696 = vst.msk [vmem:[%s4997_s3 + $0x8] sm:$0xff] %vm31_vm0, %v3694_v36 }
0x149c   :  { %3695 = vst.msk [vmem:[%s4997_s3] sm:$0xff] %vm31_vm0, %v3693_v43 }
0x149d   :  { %3701 = vsyncpa [#allocation3], 1 }

</bundles_post_ra>
